<compile_context>
chip_gen: v6e
topology: v6e:2x2x1
jax: 0.10.0
libtpu: 0.0.40
codegen_flags: <defaults>
</compile_context>

<pallas_src>
import functools
import math

import jax
import jax.numpy as jnp
from jax.experimental import pallas as pl
from jax.experimental.pallas import tpu as pltpu

_LN_EPS = 1e-5  # PyTorch nn.LayerNorm default


def _layernorm(x, w, b):
    m = jnp.mean(x, axis=-1, keepdims=True)
    c = x - m
    v = jnp.mean(c * c, axis=-1, keepdims=True)
    return c * jax.lax.rsqrt(v + _LN_EPS) * w + b


def _gelu(x):
    # tanh-approx GELU (PyTorch F.gelu default is erf-based; diff is ~1e-3).
    # TODO(synk): switch to erf-exact GELU if bit-closer parity is required.
    c = math.sqrt(2.0 / math.pi)
    return 0.5 * x * (1.0 + jnp.tanh(c * (x + 0.044715 * x * x * x)))


def _dot(a, b):
    # MXU matmul, f32 accumulation.  DEFAULT precision per perf review (HIGHEST on
    # f32 operands forces a multi-pass bf16 decomposition on the MXU).
    return jnp.dot(a, b, preferred_element_type=jnp.float32)


def _physical_vmem_bytes():
    """Physical VMEM of this TPU generation; conservative 64 MiB (v7x) fallback."""
    try:
        return int(pltpu.get_tpu_info().vmem_capacity_bytes)
    except Exception:
        return 64 * 1024 * 1024


def _choose_batch_tile(B, P, D, itemsize):
    """Samples per grid step: amortize the ~0.35us/step grid overhead and feed the
    channel-mix matmuls a (Bt*P, D) slab, while keeping the activation block small
    (<= ~4 MiB) and, when possible, >= 4 grid steps (2 per TensorCore on v7x)."""
    divisors = [d for d in range(1, B + 1) if B % d == 0]
    fits = [d for d in divisors if d * P * D * itemsize <= 4 * 1024 * 1024] or [1]
    preferred = [d for d in fits if B // d >= 4] or fits
    enough_rows = [d for d in preferred if d * P >= 256]
    return min(enough_rows) if enough_rows else max(preferred)


def _mixer_kernel(x_ref, ln1w_ref, ln1b_ref, w1_ref, b1_ref, w2_ref, b2_ref,
                  ln2w_ref, ln2b_ref, wc1t_ref, bc1_ref, wc2t_ref, bc2_ref,
                  o_ref, *, norm_pos, off_act, batch_tile, num_patches):
    act = (lambda t: t) if off_act else _gelu
    f32 = jnp.float32

    ln1w = ln1w_ref[...].astype(f32)
    ln1b = ln1b_ref[...].astype(f32)
    ln2w = ln2w_ref[...].astype(f32)
    ln2b = ln2b_ref[...].astype(f32)
    w1, b1 = w1_ref[...], b1_ref[...].astype(f32)
    w2, b2 = w2_ref[...], b2_ref[...].astype(f32)
    wc1t, bc1 = wc1t_ref[...], bc1_ref[...].astype(f32)
    wc2t, bc2 = wc2t_ref[...], bc2_ref[...].astype(f32)

    # ---- MLP1: token mixing (mixes patches within a sample -> inherently per-sample
    #      matmuls), statically unrolled over the batch tile.
    #      Dropout (do1/do2) is identity at inference.
    x1_parts = []
    for i in range(batch_tile):
        xi = x_ref[i].astype(f32)                              # (P, D)
        u = _layernorm(xi, ln1w, ln1b) if norm_pos == "Before" else xi
        h = act(_dot(w1, u.astype(w1.dtype)) + b1)             # (S, D)
        v = _dot(w2, h.astype(w2.dtype)) + b2                  # (P, D)
        if norm_pos == "After":
            v = _layernorm(v, ln1w, ln1b)
        x1_parts.append(v + xi)                                # residual
    x1 = x1_parts[0] if batch_tile == 1 else jnp.concatenate(x1_parts, axis=0)  # (Bt*P, D)

    # ---- MLP2: channel mixing on the fused (Bt*P, D) slab (fills the MXU M dim).
    u2 = _layernorm(x1, ln2w, ln2b) if norm_pos == "Before" else x1
    h2 = act(_dot(u2.astype(wc1t.dtype), wc1t) + bc1)          # (Bt*P, C)
    v2 = _dot(h2.astype(wc2t.dtype), wc2t) + bc2               # (Bt*P, D)
    if norm_pos == "After":
        v2 = _layernorm(v2, ln2w, ln2b)
    y = v2 + x1                                                # residual

    for i in range(batch_tile):
        o_ref[i] = y[i * num_patches:(i + 1) * num_patches, :].astype(o_ref.dtype)


@functools.partial(jax.jit,
                   static_argnames=("norm_pos", "off_act", "single_buffer_weights"))
def mixer_layer_forward(x, params, norm_pos="Before", off_act=False,
                        single_buffer_weights=True):
    """x: (B, num_patches, hidden_size) float32/bfloat16 -> same shape & dtype."""
    B, P, D = x.shape
    S = params["w1"].shape[0]
    C = params["wc1_t"].shape[1]
    Bt = _choose_batch_tile(B, P, D, x.dtype.itemsize)

    weight_args = (params["ln1_w"], params["ln1_b"], params["w1"], params["b1"],
                   params["w2"], params["b2"], params["ln2_w"], params["ln2_b"],
                   params["wc1_t"], params["bc1"], params["wc2_t"], params["bc2"])

    const = lambda b: (0, 0)  # weights resident across the (parallel) batch grid
    if single_buffer_weights:
        # Constant block index -> no point double-buffering: keep one VMEM copy.
        wspec = lambda shp: pl.BlockSpec(shp, const, pipeline_mode=pl.Buffered(1))
    else:
        wspec = lambda shp: pl.BlockSpec(shp, const)

    # Shape-derived VMEM budget, capped at 85% of this generation's physical VMEM
    # (v5e/v6e: 128 MiB physical, v7x: 64 MiB physical).
    act_block = Bt * P * D * x.dtype.itemsize
    weight_bytes = sum(int(a.size) * a.dtype.itemsize for a in weight_args)
    weight_bufs = 1 if single_buffer_weights else 2
    scratch_f32 = (Bt * P * (3 * D + 2 * C) + 2 * S * D + 2 * P * D) * 4
    need = int(1.5 * (4 * act_block + weight_bufs * weight_bytes + scratch_f32)) + (4 << 20)
    cap = int(0.85 * _physical_vmem_bytes())
    vmem_limit = max(min(need, cap), min(32 << 20, cap))

    kernel = functools.partial(_mixer_kernel, norm_pos=norm_pos, off_act=off_act,
                               batch_tile=Bt, num_patches=P)

    return pl.pallas_call(
        kernel,
        out_shape=jax.ShapeDtypeStruct((B, P, D), x.dtype),
        grid=(B // Bt,),
        in_specs=[
            pl.BlockSpec((Bt, P, D), lambda b: (b, 0, 0)),   # x: Bt samples per step
            wspec((1, D)), wspec((1, D)),                    # ln1 weight / bias
            wspec((S, P)), wspec((S, 1)),                    # token-mix fc1 (Conv1d P->S, k=1)
            wspec((P, S)), wspec((P, 1)),                    # token-mix fc2 (Conv1d S->P, k=1)
            wspec((1, D)), wspec((1, D)),                    # ln2 weight / bias
            wspec((D, C)), wspec((1, C)),                    # channel-mix fc1 (Linear D->C).T
            wspec((C, D)), wspec((1, D)),                    # channel-mix fc2 (Linear C->D).T
        ],
        out_specs=pl.BlockSpec((Bt, P, D), lambda b: (b, 0, 0)),
        compiler_params=pltpu.CompilerParams(
            dimension_semantics=("parallel",),   # batch grid shards across v7x's 2 TCs
            vmem_limit_bytes=vmem_limit,
        ),
        # NOTE: input_output_aliases={0: 0} (+ buffer donation) would overwrite x in
        # place; omitted so the caller's x stays valid.
    )(x, *weight_args)


def init_mixer_params(key, num_patches, hidden_size, hidden_s, hidden_c,
                      dtype=jnp.float32):
    """PyTorch-style default init (uniform +-1/sqrt(fan_in)); linear weights are
    stored pre-transposed so the kernel never transposes on the XLU."""
    ks = jax.random.split(key, 8)

    def u(k, shape, fan_in):
        bound = 1.0 / math.sqrt(fan_in)
        return jax.random.uniform(k, shape, jnp.float32, -bound, bound)

    p = {
        "ln1_w": jnp.ones((1, hidden_size), jnp.float32),
        "ln1_b": jnp.zeros((1, hidden_size), jnp.float32),
        "w1": u(ks[0], (hidden_s, num_patches), num_patches),      # Conv1d(P->S, k=1)
        "b1": u(ks[1], (hidden_s, 1), num_patches),
        "w2": u(ks[2], (num_patches, hidden_s), hidden_s),         # Conv1d(S->P, k=1)
        "b2": u(ks[3], (num_patches, 1), hidden_s),
        "ln2_w": jnp.ones((1, hidden_size), jnp.float32),
        "ln2_b": jnp.zeros((1, hidden_size), jnp.float32),
        "wc1_t": u(ks[4], (hidden_size, hidden_c), hidden_size),   # Linear(D->C).T
        "bc1": u(ks[5], (1, hidden_c), hidden_size),
        "wc2_t": u(ks[6], (hidden_c, hidden_size), hidden_c),      # Linear(C->D).T
        "bc2": u(ks[7], (1, hidden_size), hidden_c),
    }
    return jax.tree_util.tree_map(lambda a: a.astype(dtype), p)


class MixerLayerV2:
    """JAX/Pallas port of PyTorch MixerLayer_v2 (forward pass, inference)."""

    def __init__(self, params, norm_pos="Before", off_act=False, drop_p=0.0):
        self.params = params
        self.norm_pos = norm_pos
        self.off_act = off_act
        self._single_buffer = True  # pl.Buffered(1) on resident weights
        # TODO(synk): training-mode dropout (do1/do2, drop_p) not implemented;
        # inference semantics (identity) are used.

    def __call__(self, x):
        if self._single_buffer:
            try:
                return mixer_layer_forward(x, self.params, norm_pos=self.norm_pos,
                                           off_act=self.off_act,
                                           single_buffer_weights=True)
            except Exception:
                # This Pallas build rejects Buffered(1); fall back to default buffering.
                self._single_buffer = False
        return mixer_layer_forward(x, self.params, norm_pos=self.norm_pos,
                                   off_act=self.off_act, single_buffer_weights=False)


def mixer_layer_reference(x, p, norm_pos="Before", off_act=False):
    """Pure-JAX f32 ground-truth reference (HIGHEST precision) for correctness checks."""
    act = (lambda t: t) if off_act else _gelu
    hi = jax.lax.Precision.HIGHEST
    x = x.astype(jnp.float32)
    p = jax.tree_util.tree_map(lambda a: a.astype(jnp.float32), p)

    def ln(u, w, b):
        m = jnp.mean(u, axis=-1, keepdims=True)
        c = u - m
        v = jnp.mean(c * c, axis=-1, keepdims=True)
        return c * jax.lax.rsqrt(v + _LN_EPS) * w + b

    # MLP1 (token mixing)
    u = ln(x, p["ln1_w"], p["ln1_b"]) if norm_pos == "Before" else x
    h = act(jnp.einsum("sp,bpd->bsd", p["w1"], u, precision=hi) + p["b1"])
    v = jnp.einsum("ps,bsd->bpd", p["w2"], h, precision=hi) + p["b2"]
    if norm_pos == "After":
        v = ln(v, p["ln1_w"], p["ln1_b"])
    x1 = v + x
    # MLP2 (channel mixing)
    u2 = ln(x1, p["ln2_w"], p["ln2_b"]) if norm_pos == "Before" else x1
    h2 = act(jnp.einsum("bpd,dc->bpc", u2, p["wc1_t"], precision=hi) + p["bc1"])
    v2 = jnp.einsum("bpc,cd->bpd", h2, p["wc2_t"], precision=hi) + p["bc2"]
    if norm_pos == "After":
        v2 = ln(v2, p["ln2_w"], p["ln2_b"])
    return v2 + x1


if __name__ == "__main__":
    key = jax.random.PRNGKey(0)
    kx, kp = jax.random.split(key)

    # Small but TPU-friendly shapes: D and C multiples of 128 (lane-dense stores),
    # P and S multiples of 8 (sublane-aligned).  batch=8, patches=8, hidden=128.
    B, P, D, S, C = 8, 8, 128, 16, 256
    x = jax.random.normal(kx, (B, P, D), dtype=jnp.float32)
    params = init_mixer_params(kp, P, D, S, C)

    # ---- f32 I/O ----
    layer = MixerLayerV2(params, norm_pos="Before", off_act=False)
    y = jax.block_until_ready(layer(x))
    assert y.shape == x.shape and y.dtype == x.dtype
    ref = mixer_layer_reference(x, params)
    # Kernel matmuls run at DEFAULT MXU precision (perf review); the reference is
    # HIGHEST-precision f32, so allow a single-bf16-pass-sized tolerance.
    diff = float(jnp.max(jnp.abs(y - ref)))
    assert jnp.allclose(y, ref, atol=5e-2, rtol=5e-2), f"f32 max diff = {diff}"

    # ---- bf16 I/O (halves HBM traffic on this memory-bound layer) ----
    xb = x.astype(jnp.bfloat16)
    pb = jax.tree_util.tree_map(lambda a: a.astype(jnp.bfloat16), params)
    layer_b = MixerLayerV2(pb, norm_pos="Before", off_act=False)
    yb = jax.block_until_ready(layer_b(xb))
    assert yb.shape == x.shape and yb.dtype == jnp.bfloat16
    ref_b = mixer_layer_reference(xb, pb)
    diff_b = float(jnp.max(jnp.abs(yb.astype(jnp.float32) - ref_b)))
    assert jnp.allclose(yb.astype(jnp.float32), ref_b, atol=2e-1, rtol=1e-1), \
        f"bf16 max diff = {diff_b}"

    print("KERNEL_OK")
</pallas_src>

<mosaic_0001>
module attributes {stable_mosaic.version = 11 : i64} {
  func.func @_mixer_kernel(%arg0: i32, %arg1: memref<2x8x128xf32, #tpu.memory_space<vmem>>, %arg2: memref<1x128xf32, #tpu.memory_space<vmem>>, %arg3: memref<1x128xf32, #tpu.memory_space<vmem>>, %arg4: memref<16x8xf32, #tpu.memory_space<vmem>>, %arg5: memref<16x1xf32, #tpu.memory_space<vmem>>, %arg6: memref<8x16xf32, #tpu.memory_space<vmem>>, %arg7: memref<8x1xf32, #tpu.memory_space<vmem>>, %arg8: memref<1x128xf32, #tpu.memory_space<vmem>>, %arg9: memref<1x128xf32, #tpu.memory_space<vmem>>, %arg10: memref<128x256xf32, #tpu.memory_space<vmem>>, %arg11: memref<1x256xf32, #tpu.memory_space<vmem>>, %arg12: memref<256x128xf32, #tpu.memory_space<vmem>>, %arg13: memref<1x128xf32, #tpu.memory_space<vmem>>, %arg14: memref<2x8x128xf32, #tpu.memory_space<vmem>>) attributes {dimension_semantics = [#tpu.dimension_semantics<parallel>], iteration_bounds = array<i64: 4>, scalar_prefetch = 0 : i64, scratch_operands = 0 : i64, tpu.core_type = #tpu.core_type<tc>, window_params = [{transform_indices = @transform_0, window_bounds = array<i64: 2, 8, 128>}, {pipeline_mode = #tpu.pipeline_mode<synchronous>, transform_indices = @transform_1, window_bounds = array<i64: 1, 128>}, {pipeline_mode = #tpu.pipeline_mode<synchronous>, transform_indices = @transform_2, window_bounds = array<i64: 1, 128>}, {pipeline_mode = #tpu.pipeline_mode<synchronous>, transform_indices = @transform_3, window_bounds = array<i64: 16, 8>}, {pipeline_mode = #tpu.pipeline_mode<synchronous>, transform_indices = @transform_4, window_bounds = array<i64: 16, 1>}, {pipeline_mode = #tpu.pipeline_mode<synchronous>, transform_indices = @transform_5, window_bounds = array<i64: 8, 16>}, {pipeline_mode = #tpu.pipeline_mode<synchronous>, transform_indices = @transform_6, window_bounds = array<i64: 8, 1>}, {pipeline_mode = #tpu.pipeline_mode<synchronous>, transform_indices = @transform_7, window_bounds = array<i64: 1, 128>}, {pipeline_mode = #tpu.pipeline_mode<synchronous>, transform_indices = @transform_8, window_bounds = array<i64: 1, 128>}, {pipeline_mode = #tpu.pipeline_mode<synchronous>, transform_indices = @transform_9, window_bounds = array<i64: 128, 256>}, {pipeline_mode = #tpu.pipeline_mode<synchronous>, transform_indices = @transform_10, window_bounds = array<i64: 1, 256>}, {pipeline_mode = #tpu.pipeline_mode<synchronous>, transform_indices = @transform_11, window_bounds = array<i64: 256, 128>}, {pipeline_mode = #tpu.pipeline_mode<synchronous>, transform_indices = @transform_12, window_bounds = array<i64: 1, 128>}, {transform_indices = @transform_13, window_bounds = array<i64: 2, 8, 128>}]} {
    %c0 = arith.constant 0 : index
    %c0_0 = arith.constant 0 : index
    %0 = vector.load %arg2[%c0, %c0_0] : memref<1x128xf32, #tpu.memory_space<vmem>>, vector<1x128xf32>
    %c0_1 = arith.constant 0 : index
    %c0_2 = arith.constant 0 : index
    %1 = vector.load %arg3[%c0_1, %c0_2] : memref<1x128xf32, #tpu.memory_space<vmem>>, vector<1x128xf32>
    %c0_3 = arith.constant 0 : index
    %c0_4 = arith.constant 0 : index
    %2 = vector.load %arg8[%c0_3, %c0_4] : memref<1x128xf32, #tpu.memory_space<vmem>>, vector<1x128xf32>
    %c0_5 = arith.constant 0 : index
    %c0_6 = arith.constant 0 : index
    %3 = vector.load %arg9[%c0_5, %c0_6] : memref<1x128xf32, #tpu.memory_space<vmem>>, vector<1x128xf32>
    %c0_7 = arith.constant 0 : index
    %c0_8 = arith.constant 0 : index
    %4 = vector.load %arg4[%c0_7, %c0_8] : memref<16x8xf32, #tpu.memory_space<vmem>>, vector<16x8xf32>
    %c0_9 = arith.constant 0 : index
    %c0_10 = arith.constant 0 : index
    %5 = vector.load %arg5[%c0_9, %c0_10] : memref<16x1xf32, #tpu.memory_space<vmem>>, vector<16x1xf32>
    %c0_11 = arith.constant 0 : index
    %c0_12 = arith.constant 0 : index
    %6 = vector.load %arg6[%c0_11, %c0_12] : memref<8x16xf32, #tpu.memory_space<vmem>>, vector<8x16xf32>
    %c0_13 = arith.constant 0 : index
    %c0_14 = arith.constant 0 : index
    %7 = vector.load %arg7[%c0_13, %c0_14] : memref<8x1xf32, #tpu.memory_space<vmem>>, vector<8x1xf32>
    %c0_15 = arith.constant 0 : index
    %c0_16 = arith.constant 0 : index
    %8 = vector.load %arg10[%c0_15, %c0_16] : memref<128x256xf32, #tpu.memory_space<vmem>>, vector<128x256xf32>
    %c0_17 = arith.constant 0 : index
    %c0_18 = arith.constant 0 : index
    %9 = vector.load %arg11[%c0_17, %c0_18] : memref<1x256xf32, #tpu.memory_space<vmem>>, vector<1x256xf32>
    %c0_19 = arith.constant 0 : index
    %c0_20 = arith.constant 0 : index
    %10 = vector.load %arg12[%c0_19, %c0_20] : memref<256x128xf32, #tpu.memory_space<vmem>>, vector<256x128xf32>
    %c0_21 = arith.constant 0 : index
    %c0_22 = arith.constant 0 : index
    %11 = vector.load %arg13[%c0_21, %c0_22] : memref<1x128xf32, #tpu.memory_space<vmem>>, vector<1x128xf32>
    %c0_23 = arith.constant 0 : index
    %c0_24 = arith.constant 0 : index
    %c0_25 = arith.constant 0 : index
    %12 = vector.load %arg1[%c0_23, %c0_24, %c0_25] : memref<2x8x128xf32, #tpu.memory_space<vmem>>, vector<1x8x128xf32>
    %13 = vector.shape_cast %12 : vector<1x8x128xf32> to vector<8x128xf32>
    %cst = arith.constant dense<0.000000e+00> : vector<8xf32>
    %14 = vector.multi_reduction <add>, %13, %cst [1] : vector<8x128xf32> to vector<8xf32>
    %15 = vector.shape_cast %14 : vector<8xf32> to vector<8x1xf32>
    %cst_26 = arith.constant 1.280000e+02 : f32
    %16 = vector.broadcast %cst_26 : f32 to vector<8x1xf32>
    %17 = arith.divf %15, %16 : vector<8x1xf32>
    %18 = vector.broadcast %17 : vector<8x1xf32> to vector<8x128xf32>
    %19 = arith.subf %13, %18 : vector<8x128xf32>
    %20 = arith.mulf %19, %19 : vector<8x128xf32>
    %cst_27 = arith.constant dense<0.000000e+00> : vector<8xf32>
    %21 = vector.multi_reduction <add>, %20, %cst_27 [1] : vector<8x128xf32> to vector<8xf32>
    %22 = vector.shape_cast %21 : vector<8xf32> to vector<8x1xf32>
    %cst_28 = arith.constant 1.280000e+02 : f32
    %23 = vector.broadcast %cst_28 : f32 to vector<8x1xf32>
    %24 = arith.divf %22, %23 : vector<8x1xf32>
    %cst_29 = arith.constant 9.99999974E-6 : f32
    %25 = vector.broadcast %cst_29 : f32 to vector<8x1xf32>
    %26 = arith.addf %24, %25 : vector<8x1xf32>
    %27 = math.rsqrt %26 : vector<8x1xf32>
    %28 = vector.broadcast %27 : vector<8x1xf32> to vector<8x128xf32>
    %29 = arith.mulf %19, %28 : vector<8x128xf32>
    %30 = vector.broadcast %0 : vector<1x128xf32> to vector<8x128xf32>
    %31 = arith.mulf %29, %30 : vector<8x128xf32>
    %32 = vector.broadcast %1 : vector<1x128xf32> to vector<8x128xf32>
    %33 = arith.addf %31, %32 : vector<8x128xf32>
    %cst_30 = arith.constant dense<0.000000e+00> : vector<16x128xf32>
    %34 = tpu.matmul %4, %33, %cst_30 {dimension_numbers = #tpu.dot_dimension_numbers<[1], [0], [0], [1], [0, 0, 1, 1], [], []>} : vector<16x8xf32>, vector<8x128xf32>, vector<16x128xf32> -> vector<16x128xf32>
    %35 = vector.broadcast %5 : vector<16x1xf32> to vector<16x128xf32>
    %36 = arith.addf %34, %35 : vector<16x128xf32>
    %cst_31 = arith.constant 5.000000e-01 : f32
    %37 = vector.broadcast %cst_31 : f32 to vector<16x128xf32>
    %38 = arith.mulf %37, %36 : vector<16x128xf32>
    %cst_32 = arith.constant 4.471500e-02 : f32
    %39 = vector.broadcast %cst_32 : f32 to vector<16x128xf32>
    %40 = arith.mulf %39, %36 : vector<16x128xf32>
    %41 = arith.mulf %40, %36 : vector<16x128xf32>
    %42 = arith.mulf %41, %36 : vector<16x128xf32>
    %43 = arith.addf %36, %42 : vector<16x128xf32>
    %cst_33 = arith.constant 0.797884583 : f32
    %44 = vector.broadcast %cst_33 : f32 to vector<16x128xf32>
    %45 = arith.mulf %44, %43 : vector<16x128xf32>
    %46 = math.tanh %45 : vector<16x128xf32>
    %cst_34 = arith.constant 1.000000e+00 : f32
    %47 = vector.broadcast %cst_34 : f32 to vector<16x128xf32>
    %48 = arith.addf %47, %46 : vector<16x128xf32>
    %49 = arith.mulf %38, %48 : vector<16x128xf32>
    %cst_35 = arith.constant dense<0.000000e+00> : vector<8x128xf32>
    %50 = tpu.matmul %6, %49, %cst_35 {dimension_numbers = #tpu.dot_dimension_numbers<[1], [0], [0], [1], [0, 0, 1, 1], [], []>} : vector<8x16xf32>, vector<16x128xf32>, vector<8x128xf32> -> vector<8x128xf32>
    %51 = vector.broadcast %7 : vector<8x1xf32> to vector<8x128xf32>
    %52 = arith.addf %50, %51 : vector<8x128xf32>
    %53 = arith.addf %52, %13 : vector<8x128xf32>
    %c1 = arith.constant 1 : index
    %c0_36 = arith.constant 0 : index
    %c0_37 = arith.constant 0 : index
    %54 = vector.load %arg1[%c1, %c0_36, %c0_37] : memref<2x8x128xf32, #tpu.memory_space<vmem>>, vector<1x8x128xf32>
    %55 = vector.shape_cast %54 : vector<1x8x128xf32> to vector<8x128xf32>
    %cst_38 = arith.constant dense<0.000000e+00> : vector<8xf32>
    %56 = vector.multi_reduction <add>, %55, %cst_38 [1] : vector<8x128xf32> to vector<8xf32>
    %57 = vector.shape_cast %56 : vector<8xf32> to vector<8x1xf32>
    %cst_39 = arith.constant 1.280000e+02 : f32
    %58 = vector.broadcast %cst_39 : f32 to vector<8x1xf32>
    %59 = arith.divf %57, %58 : vector<8x1xf32>
    %60 = vector.broadcast %59 : vector<8x1xf32> to vector<8x128xf32>
    %61 = arith.subf %55, %60 : vector<8x128xf32>
    %62 = arith.mulf %61, %61 : vector<8x128xf32>
    %cst_40 = arith.constant dense<0.000000e+00> : vector<8xf32>
    %63 = vector.multi_reduction <add>, %62, %cst_40 [1] : vector<8x128xf32> to vector<8xf32>
    %64 = vector.shape_cast %63 : vector<8xf32> to vector<8x1xf32>
    %cst_41 = arith.constant 1.280000e+02 : f32
    %65 = vector.broadcast %cst_41 : f32 to vector<8x1xf32>
    %66 = arith.divf %64, %65 : vector<8x1xf32>
    %cst_42 = arith.constant 9.99999974E-6 : f32
    %67 = vector.broadcast %cst_42 : f32 to vector<8x1xf32>
    %68 = arith.addf %66, %67 : vector<8x1xf32>
    %69 = math.rsqrt %68 : vector<8x1xf32>
    %70 = vector.broadcast %69 : vector<8x1xf32> to vector<8x128xf32>
    %71 = arith.mulf %61, %70 : vector<8x128xf32>
    %72 = vector.broadcast %0 : vector<1x128xf32> to vector<8x128xf32>
    %73 = arith.mulf %71, %72 : vector<8x128xf32>
    %74 = vector.broadcast %1 : vector<1x128xf32> to vector<8x128xf32>
    %75 = arith.addf %73, %74 : vector<8x128xf32>
    %cst_43 = arith.constant dense<0.000000e+00> : vector<16x128xf32>
    %76 = tpu.matmul %4, %75, %cst_43 {dimension_numbers = #tpu.dot_dimension_numbers<[1], [0], [0], [1], [0, 0, 1, 1], [], []>} : vector<16x8xf32>, vector<8x128xf32>, vector<16x128xf32> -> vector<16x128xf32>
    %77 = vector.broadcast %5 : vector<16x1xf32> to vector<16x128xf32>
    %78 = arith.addf %76, %77 : vector<16x128xf32>
    %cst_44 = arith.constant 5.000000e-01 : f32
    %79 = vector.broadcast %cst_44 : f32 to vector<16x128xf32>
    %80 = arith.mulf %79, %78 : vector<16x128xf32>
    %cst_45 = arith.constant 4.471500e-02 : f32
    %81 = vector.broadcast %cst_45 : f32 to vector<16x128xf32>
    %82 = arith.mulf %81, %78 : vector<16x128xf32>
    %83 = arith.mulf %82, %78 : vector<16x128xf32>
    %84 = arith.mulf %83, %78 : vector<16x128xf32>
    %85 = arith.addf %78, %84 : vector<16x128xf32>
    %cst_46 = arith.constant 0.797884583 : f32
    %86 = vector.broadcast %cst_46 : f32 to vector<16x128xf32>
    %87 = arith.mulf %86, %85 : vector<16x128xf32>
    %88 = math.tanh %87 : vector<16x128xf32>
    %cst_47 = arith.constant 1.000000e+00 : f32
    %89 = vector.broadcast %cst_47 : f32 to vector<16x128xf32>
    %90 = arith.addf %89, %88 : vector<16x128xf32>
    %91 = arith.mulf %80, %90 : vector<16x128xf32>
    %cst_48 = arith.constant dense<0.000000e+00> : vector<8x128xf32>
    %92 = tpu.matmul %6, %91, %cst_48 {dimension_numbers = #tpu.dot_dimension_numbers<[1], [0], [0], [1], [0, 0, 1, 1], [], []>} : vector<8x16xf32>, vector<16x128xf32>, vector<8x128xf32> -> vector<8x128xf32>
    %93 = vector.broadcast %7 : vector<8x1xf32> to vector<8x128xf32>
    %94 = arith.addf %92, %93 : vector<8x128xf32>
    %95 = arith.addf %94, %55 : vector<8x128xf32>
    %96 = tpu.concatenate %53, %95 in 0 : vector<8x128xf32>, vector<8x128xf32> -> vector<16x128xf32>
    %cst_49 = arith.constant dense<0.000000e+00> : vector<16xf32>
    %97 = vector.multi_reduction <add>, %96, %cst_49 [1] : vector<16x128xf32> to vector<16xf32>
    %98 = vector.shape_cast %97 : vector<16xf32> to vector<16x1xf32>
    %cst_50 = arith.constant 1.280000e+02 : f32
    %99 = vector.broadcast %cst_50 : f32 to vector<16x1xf32>
    %100 = arith.divf %98, %99 : vector<16x1xf32>
    %101 = vector.broadcast %100 : vector<16x1xf32> to vector<16x128xf32>
    %102 = arith.subf %96, %101 : vector<16x128xf32>
    %103 = arith.mulf %102, %102 : vector<16x128xf32>
    %cst_51 = arith.constant dense<0.000000e+00> : vector<16xf32>
    %104 = vector.multi_reduction <add>, %103, %cst_51 [1] : vector<16x128xf32> to vector<16xf32>
    %105 = vector.shape_cast %104 : vector<16xf32> to vector<16x1xf32>
    %cst_52 = arith.constant 1.280000e+02 : f32
    %106 = vector.broadcast %cst_52 : f32 to vector<16x1xf32>
    %107 = arith.divf %105, %106 : vector<16x1xf32>
    %cst_53 = arith.constant 9.99999974E-6 : f32
    %108 = vector.broadcast %cst_53 : f32 to vector<16x1xf32>
    %109 = arith.addf %107, %108 : vector<16x1xf32>
    %110 = math.rsqrt %109 : vector<16x1xf32>
    %111 = vector.broadcast %110 : vector<16x1xf32> to vector<16x128xf32>
    %112 = arith.mulf %102, %111 : vector<16x128xf32>
    %113 = vector.broadcast %2 : vector<1x128xf32> to vector<16x128xf32>
    %114 = arith.mulf %112, %113 : vector<16x128xf32>
    %115 = vector.broadcast %3 : vector<1x128xf32> to vector<16x128xf32>
    %116 = arith.addf %114, %115 : vector<16x128xf32>
    %cst_54 = arith.constant dense<0.000000e+00> : vector<16x256xf32>
    %117 = tpu.matmul %116, %8, %cst_54 {dimension_numbers = #tpu.dot_dimension_numbers<[1], [0], [0], [1], [0, 0, 1, 1], [], []>} : vector<16x128xf32>, vector<128x256xf32>, vector<16x256xf32> -> vector<16x256xf32>
    %118 = vector.broadcast %9 : vector<1x256xf32> to vector<16x256xf32>
    %119 = arith.addf %117, %118 : vector<16x256xf32>
    %cst_55 = arith.constant 5.000000e-01 : f32
    %120 = vector.broadcast %cst_55 : f32 to vector<16x256xf32>
    %121 = arith.mulf %120, %119 : vector<16x256xf32>
    %cst_56 = arith.constant 4.471500e-02 : f32
    %122 = vector.broadcast %cst_56 : f32 to vector<16x256xf32>
    %123 = arith.mulf %122, %119 : vector<16x256xf32>
    %124 = arith.mulf %123, %119 : vector<16x256xf32>
    %125 = arith.mulf %124, %119 : vector<16x256xf32>
    %126 = arith.addf %119, %125 : vector<16x256xf32>
    %cst_57 = arith.constant 0.797884583 : f32
    %127 = vector.broadcast %cst_57 : f32 to vector<16x256xf32>
    %128 = arith.mulf %127, %126 : vector<16x256xf32>
    %129 = math.tanh %128 : vector<16x256xf32>
    %cst_58 = arith.constant 1.000000e+00 : f32
    %130 = vector.broadcast %cst_58 : f32 to vector<16x256xf32>
    %131 = arith.addf %130, %129 : vector<16x256xf32>
    %132 = arith.mulf %121, %131 : vector<16x256xf32>
    %cst_59 = arith.constant dense<0.000000e+00> : vector<16x128xf32>
    %133 = tpu.matmul %132, %10, %cst_59 {dimension_numbers = #tpu.dot_dimension_numbers<[1], [0], [0], [1], [0, 0, 1, 1], [], []>} : vector<16x256xf32>, vector<256x128xf32>, vector<16x128xf32> -> vector<16x128xf32>
    %134 = vector.broadcast %11 : vector<1x128xf32> to vector<16x128xf32>
    %135 = arith.addf %133, %134 : vector<16x128xf32>
    %136 = arith.addf %135, %96 : vector<16x128xf32>
    %137 = vector.extract_strided_slice %136 {offsets = [0, 0], sizes = [8, 128], strides = [1, 1]} : vector<16x128xf32> to vector<8x128xf32>
    %c0_60 = arith.constant 0 : index
    %c0_61 = arith.constant 0 : index
    %c0_62 = arith.constant 0 : index
    %138 = vector.load %arg14[%c0_60, %c0_61, %c0_62] : memref<2x8x128xf32, #tpu.memory_space<vmem>>, vector<1x8x128xf32>
    %139 = vector.shape_cast %138 : vector<1x8x128xf32> to vector<8x128xf32>
    %140 = vector.shape_cast %137 : vector<8x128xf32> to vector<1x8x128xf32>
    tpu.vector_store %arg14[%c0_60, %c0_61, %c0_62], %140 {strides = array<i32>} : memref<2x8x128xf32, #tpu.memory_space<vmem>>, vector<1x8x128xf32>,
    %141 = vector.extract_strided_slice %136 {offsets = [8, 0], sizes = [8, 128], strides = [1, 1]} : vector<16x128xf32> to vector<8x128xf32>
    %c1_63 = arith.constant 1 : index
    %c0_64 = arith.constant 0 : index
    %c0_65 = arith.constant 0 : index
    %142 = vector.load %arg14[%c1_63, %c0_64, %c0_65] : memref<2x8x128xf32, #tpu.memory_space<vmem>>, vector<1x8x128xf32>
    %143 = vector.shape_cast %142 : vector<1x8x128xf32> to vector<8x128xf32>
    %144 = vector.shape_cast %141 : vector<8x128xf32> to vector<1x8x128xf32>
    tpu.vector_store %arg14[%c1_63, %c0_64, %c0_65], %144 {strides = array<i32>} : memref<2x8x128xf32, #tpu.memory_space<vmem>>, vector<1x8x128xf32>,
    return
  }
  func.func @transform_0(%arg0: i32) -> (i32, i32, i32) {
    %c0_i32 = arith.constant 0 : i32
    %c0_i32_0 = arith.constant 0 : i32
    %c0_i32_1 = arith.constant 0 : i32
    return %arg0, %c0_i32, %c0_i32_0 : i32, i32, i32
  }
  func.func @transform_1(%arg0: i32) -> (i32, i32) {
    %c0_i32 = arith.constant 0 : i32
    %c0_i32_0 = arith.constant 0 : i32
    %c0_i32_1 = arith.constant 0 : i32
    return %c0_i32, %c0_i32_0 : i32, i32
  }
  func.func @transform_2(%arg0: i32) -> (i32, i32) {
    %c0_i32 = arith.constant 0 : i32
    %c0_i32_0 = arith.constant 0 : i32
    %c0_i32_1 = arith.constant 0 : i32
    return %c0_i32, %c0_i32_0 : i32, i32
  }
  func.func @transform_3(%arg0: i32) -> (i32, i32) {
    %c0_i32 = arith.constant 0 : i32
    %c0_i32_0 = arith.constant 0 : i32
    %c0_i32_1 = arith.constant 0 : i32
    return %c0_i32, %c0_i32_0 : i32, i32
  }
  func.func @transform_4(%arg0: i32) -> (i32, i32) {
    %c0_i32 = arith.constant 0 : i32
    %c0_i32_0 = arith.constant 0 : i32
    %c0_i32_1 = arith.constant 0 : i32
    return %c0_i32, %c0_i32_0 : i32, i32
  }
  func.func @transform_5(%arg0: i32) -> (i32, i32) {
    %c0_i32 = arith.constant 0 : i32
    %c0_i32_0 = arith.constant 0 : i32
    %c0_i32_1 = arith.constant 0 : i32
    return %c0_i32, %c0_i32_0 : i32, i32
  }
  func.func @transform_6(%arg0: i32) -> (i32, i32) {
    %c0_i32 = arith.constant 0 : i32
    %c0_i32_0 = arith.constant 0 : i32
    %c0_i32_1 = arith.constant 0 : i32
    return %c0_i32, %c0_i32_0 : i32, i32
  }
  func.func @transform_7(%arg0: i32) -> (i32, i32) {
    %c0_i32 = arith.constant 0 : i32
    %c0_i32_0 = arith.constant 0 : i32
    %c0_i32_1 = arith.constant 0 : i32
    return %c0_i32, %c0_i32_0 : i32, i32
  }
  func.func @transform_8(%arg0: i32) -> (i32, i32) {
    %c0_i32 = arith.constant 0 : i32
    %c0_i32_0 = arith.constant 0 : i32
    %c0_i32_1 = arith.constant 0 : i32
    return %c0_i32, %c0_i32_0 : i32, i32
  }
  func.func @transform_9(%arg0: i32) -> (i32, i32) {
    %c0_i32 = arith.constant 0 : i32
    %c0_i32_0 = arith.constant 0 : i32
    %c0_i32_1 = arith.constant 0 : i32
    return %c0_i32, %c0_i32_0 : i32, i32
  }
  func.func @transform_10(%arg0: i32) -> (i32, i32) {
    %c0_i32 = arith.constant 0 : i32
    %c0_i32_0 = arith.constant 0 : i32
    %c0_i32_1 = arith.constant 0 : i32
    return %c0_i32, %c0_i32_0 : i32, i32
  }
  func.func @transform_11(%arg0: i32) -> (i32, i32) {
    %c0_i32 = arith.constant 0 : i32
    %c0_i32_0 = arith.constant 0 : i32
    %c0_i32_1 = arith.constant 0 : i32
    return %c0_i32, %c0_i32_0 : i32, i32
  }
  func.func @transform_12(%arg0: i32) -> (i32, i32) {
    %c0_i32 = arith.constant 0 : i32
    %c0_i32_0 = arith.constant 0 : i32
    %c0_i32_1 = arith.constant 0 : i32
    return %c0_i32, %c0_i32_0 : i32, i32
  }
  func.func @transform_13(%arg0: i32) -> (i32, i32, i32) {
    %c0_i32 = arith.constant 0 : i32
    %c0_i32_0 = arith.constant 0 : i32
    %c0_i32_1 = arith.constant 0 : i32
    return %arg0, %c0_i32, %c0_i32_0 : i32, i32, i32
  }
}

module attributes {stable_mosaic.version = 11 : i64} {
  func.func @_mixer_kernel(%arg0: i32, %arg1: memref<2x8x128xf32, #tpu.memory_space<vmem>>, %arg2: memref<1x128xf32, #tpu.memory_space<vmem>>, %arg3: memref<1x128xf32, #tpu.memory_space<vmem>>, %arg4: memref<16x8xf32, #tpu.memory_space<vmem>>, %arg5: memref<16x1xf32, #tpu.memory_space<vmem>>, %arg6: memref<8x16xf32, #tpu.memory_space<vmem>>, %arg7: memref<8x1xf32, #tpu.memory_space<vmem>>, %arg8: memref<1x128xf32, #tpu.memory_space<vmem>>, %arg9: memref<1x128xf32, #tpu.memory_space<vmem>>, %arg10: memref<128x256xf32, #tpu.memory_space<vmem>>, %arg11: memref<1x256xf32, #tpu.memory_space<vmem>>, %arg12: memref<256x128xf32, #tpu.memory_space<vmem>>, %arg13: memref<1x128xf32, #tpu.memory_space<vmem>>, %arg14: memref<2x8x128xf32, #tpu.memory_space<vmem>>) attributes {dimension_semantics = [#tpu.dimension_semantics<parallel>], iteration_bounds = array<i64: 4>, scalar_prefetch = 0 : i64, scratch_operands = 0 : i64, tpu.core_type = #tpu.core_type<tc>, window_params = [{transform_indices = @transform_0, window_bounds = array<i64: 2, 8, 128>}, {pipeline_mode = #tpu.pipeline_mode<synchronous>, transform_indices = @transform_1, window_bounds = array<i64: 1, 128>}, {pipeline_mode = #tpu.pipeline_mode<synchronous>, transform_indices = @transform_2, window_bounds = array<i64: 1, 128>}, {pipeline_mode = #tpu.pipeline_mode<synchronous>, transform_indices = @transform_3, window_bounds = array<i64: 16, 8>}, {pipeline_mode = #tpu.pipeline_mode<synchronous>, transform_indices = @transform_4, window_bounds = array<i64: 16, 1>}, {pipeline_mode = #tpu.pipeline_mode<synchronous>, transform_indices = @transform_5, window_bounds = array<i64: 8, 16>}, {pipeline_mode = #tpu.pipeline_mode<synchronous>, transform_indices = @transform_6, window_bounds = array<i64: 8, 1>}, {pipeline_mode = #tpu.pipeline_mode<synchronous>, transform_indices = @transform_7, window_bounds = array<i64: 1, 128>}, {pipeline_mode = #tpu.pipeline_mode<synchronous>, transform_indices = @transform_8, window_bounds = array<i64: 1, 128>}, {pipeline_mode = #tpu.pipeline_mode<synchronous>, transform_indices = @transform_9, window_bounds = array<i64: 128, 256>}, {pipeline_mode = #tpu.pipeline_mode<synchronous>, transform_indices = @transform_10, window_bounds = array<i64: 1, 256>}, {pipeline_mode = #tpu.pipeline_mode<synchronous>, transform_indices = @transform_11, window_bounds = array<i64: 256, 128>}, {pipeline_mode = #tpu.pipeline_mode<synchronous>, transform_indices = @transform_12, window_bounds = array<i64: 1, 128>}, {transform_indices = @transform_13, window_bounds = array<i64: 2, 8, 128>}]} {
    %c0 = arith.constant 0 : index
    %c0_0 = arith.constant 0 : index
    %0 = vector.load %arg2[%c0, %c0_0] : memref<1x128xf32, #tpu.memory_space<vmem>>, vector<1x128xf32>
    %c0_1 = arith.constant 0 : index
    %c0_2 = arith.constant 0 : index
    %1 = vector.load %arg3[%c0_1, %c0_2] : memref<1x128xf32, #tpu.memory_space<vmem>>, vector<1x128xf32>
    %c0_3 = arith.constant 0 : index
    %c0_4 = arith.constant 0 : index
    %2 = vector.load %arg8[%c0_3, %c0_4] : memref<1x128xf32, #tpu.memory_space<vmem>>, vector<1x128xf32>
    %c0_5 = arith.constant 0 : index
    %c0_6 = arith.constant 0 : index
    %3 = vector.load %arg9[%c0_5, %c0_6] : memref<1x128xf32, #tpu.memory_space<vmem>>, vector<1x128xf32>
    %c0_7 = arith.constant 0 : index
    %c0_8 = arith.constant 0 : index
    %4 = vector.load %arg4[%c0_7, %c0_8] : memref<16x8xf32, #tpu.memory_space<vmem>>, vector<16x8xf32>
    %c0_9 = arith.constant 0 : index
    %c0_10 = arith.constant 0 : index
    %5 = vector.load %arg5[%c0_9, %c0_10] : memref<16x1xf32, #tpu.memory_space<vmem>>, vector<16x1xf32>
    %c0_11 = arith.constant 0 : index
    %c0_12 = arith.constant 0 : index
    %6 = vector.load %arg6[%c0_11, %c0_12] : memref<8x16xf32, #tpu.memory_space<vmem>>, vector<8x16xf32>
    %c0_13 = arith.constant 0 : index
    %c0_14 = arith.constant 0 : index
    %7 = vector.load %arg7[%c0_13, %c0_14] : memref<8x1xf32, #tpu.memory_space<vmem>>, vector<8x1xf32>
    %c0_15 = arith.constant 0 : index
    %c0_16 = arith.constant 0 : index
    %8 = vector.load %arg10[%c0_15, %c0_16] : memref<128x256xf32, #tpu.memory_space<vmem>>, vector<128x256xf32>
    %c0_17 = arith.constant 0 : index
    %c0_18 = arith.constant 0 : index
    %9 = vector.load %arg11[%c0_17, %c0_18] : memref<1x256xf32, #tpu.memory_space<vmem>>, vector<1x256xf32>
    %c0_19 = arith.constant 0 : index
    %c0_20 = arith.constant 0 : index
    %10 = vector.load %arg12[%c0_19, %c0_20] : memref<256x128xf32, #tpu.memory_space<vmem>>, vector<256x128xf32>
    %c0_21 = arith.constant 0 : index
    %c0_22 = arith.constant 0 : index
    %11 = vector.load %arg13[%c0_21, %c0_22] : memref<1x128xf32, #tpu.memory_space<vmem>>, vector<1x128xf32>
    %c0_23 = arith.constant 0 : index
    %c0_24 = arith.constant 0 : index
    %c0_25 = arith.constant 0 : index
    %12 = vector.load %arg1[%c0_23, %c0_24, %c0_25] : memref<2x8x128xf32, #tpu.memory_space<vmem>>, vector<1x8x128xf32>
    %13 = vector.shape_cast %12 : vector<1x8x128xf32> to vector<8x128xf32>
    %cst = arith.constant dense<0.000000e+00> : vector<8xf32>
    %14 = vector.multi_reduction <add>, %13, %cst [1] : vector<8x128xf32> to vector<8xf32>
    %15 = vector.shape_cast %14 : vector<8xf32> to vector<8x1xf32>
    %cst_26 = arith.constant 1.280000e+02 : f32
    %16 = vector.broadcast %cst_26 : f32 to vector<8x1xf32>
    %17 = arith.divf %15, %16 : vector<8x1xf32>
    %18 = vector.broadcast %17 : vector<8x1xf32> to vector<8x128xf32>
    %19 = arith.subf %13, %18 : vector<8x128xf32>
    %20 = arith.mulf %19, %19 : vector<8x128xf32>
    %cst_27 = arith.constant dense<0.000000e+00> : vector<8xf32>
    %21 = vector.multi_reduction <add>, %20, %cst_27 [1] : vector<8x128xf32> to vector<8xf32>
    %22 = vector.shape_cast %21 : vector<8xf32> to vector<8x1xf32>
    %cst_28 = arith.constant 1.280000e+02 : f32
    %23 = vector.broadcast %cst_28 : f32 to vector<8x1xf32>
    %24 = arith.divf %22, %23 : vector<8x1xf32>
    %cst_29 = arith.constant 9.99999974E-6 : f32
    %25 = vector.broadcast %cst_29 : f32 to vector<8x1xf32>
    %26 = arith.addf %24, %25 : vector<8x1xf32>
    %27 = math.rsqrt %26 : vector<8x1xf32>
    %28 = vector.broadcast %27 : vector<8x1xf32> to vector<8x128xf32>
    %29 = arith.mulf %19, %28 : vector<8x128xf32>
    %30 = vector.broadcast %0 : vector<1x128xf32> to vector<8x128xf32>
    %31 = arith.mulf %29, %30 : vector<8x128xf32>
    %32 = vector.broadcast %1 : vector<1x128xf32> to vector<8x128xf32>
    %33 = arith.addf %31, %32 : vector<8x128xf32>
    %cst_30 = arith.constant dense<0.000000e+00> : vector<16x128xf32>
    %34 = tpu.matmul %4, %33, %cst_30 {dimension_numbers = #tpu.dot_dimension_numbers<[1], [0], [0], [1], [0, 0, 1, 1], [], []>} : vector<16x8xf32>, vector<8x128xf32>, vector<16x128xf32> -> vector<16x128xf32>
    %35 = vector.broadcast %5 : vector<16x1xf32> to vector<16x128xf32>
    %36 = arith.addf %34, %35 : vector<16x128xf32>
    %cst_31 = arith.constant 5.000000e-01 : f32
    %37 = vector.broadcast %cst_31 : f32 to vector<16x128xf32>
    %38 = arith.mulf %37, %36 : vector<16x128xf32>
    %cst_32 = arith.constant 4.471500e-02 : f32
    %39 = vector.broadcast %cst_32 : f32 to vector<16x128xf32>
    %40 = arith.mulf %39, %36 : vector<16x128xf32>
    %41 = arith.mulf %40, %36 : vector<16x128xf32>
    %42 = arith.mulf %41, %36 : vector<16x128xf32>
    %43 = arith.addf %36, %42 : vector<16x128xf32>
    %cst_33 = arith.constant 0.797884583 : f32
    %44 = vector.broadcast %cst_33 : f32 to vector<16x128xf32>
    %45 = arith.mulf %44, %43 : vector<16x128xf32>
    %46 = math.tanh %45 : vector<16x128xf32>
    %cst_34 = arith.constant 1.000000e+00 : f32
    %47 = vector.broadcast %cst_34 : f32 to vector<16x128xf32>
    %48 = arith.addf %47, %46 : vector<16x128xf32>
    %49 = arith.mulf %38, %48 : vector<16x128xf32>
    %cst_35 = arith.constant dense<0.000000e+00> : vector<8x128xf32>
    %50 = tpu.matmul %6, %49, %cst_35 {dimension_numbers = #tpu.dot_dimension_numbers<[1], [0], [0], [1], [0, 0, 1, 1], [], []>} : vector<8x16xf32>, vector<16x128xf32>, vector<8x128xf32> -> vector<8x128xf32>
    %51 = vector.broadcast %7 : vector<8x1xf32> to vector<8x128xf32>
    %52 = arith.addf %50, %51 : vector<8x128xf32>
    %53 = arith.addf %52, %13 : vector<8x128xf32>
    %c1 = arith.constant 1 : index
    %c0_36 = arith.constant 0 : index
    %c0_37 = arith.constant 0 : index
    %54 = vector.load %arg1[%c1, %c0_36, %c0_37] : memref<2x8x128xf32, #tpu.memory_space<vmem>>, vector<1x8x128xf32>
    %55 = vector.shape_cast %54 : vector<1x8x128xf32> to vector<8x128xf32>
    %cst_38 = arith.constant dense<0.000000e+00> : vector<8xf32>
    %56 = vector.multi_reduction <add>, %55, %cst_38 [1] : vector<8x128xf32> to vector<8xf32>
    %57 = vector.shape_cast %56 : vector<8xf32> to vector<8x1xf32>
    %cst_39 = arith.constant 1.280000e+02 : f32
    %58 = vector.broadcast %cst_39 : f32 to vector<8x1xf32>
    %59 = arith.divf %57, %58 : vector<8x1xf32>
    %60 = vector.broadcast %59 : vector<8x1xf32> to vector<8x128xf32>
    %61 = arith.subf %55, %60 : vector<8x128xf32>
    %62 = arith.mulf %61, %61 : vector<8x128xf32>
    %cst_40 = arith.constant dense<0.000000e+00> : vector<8xf32>
    %63 = vector.multi_reduction <add>, %62, %cst_40 [1] : vector<8x128xf32> to vector<8xf32>
    %64 = vector.shape_cast %63 : vector<8xf32> to vector<8x1xf32>
    %cst_41 = arith.constant 1.280000e+02 : f32
    %65 = vector.broadcast %cst_41 : f32 to vector<8x1xf32>
    %66 = arith.divf %64, %65 : vector<8x1xf32>
    %cst_42 = arith.constant 9.99999974E-6 : f32
    %67 = vector.broadcast %cst_42 : f32 to vector<8x1xf32>
    %68 = arith.addf %66, %67 : vector<8x1xf32>
    %69 = math.rsqrt %68 : vector<8x1xf32>
    %70 = vector.broadcast %69 : vector<8x1xf32> to vector<8x128xf32>
    %71 = arith.mulf %61, %70 : vector<8x128xf32>
    %72 = vector.broadcast %0 : vector<1x128xf32> to vector<8x128xf32>
    %73 = arith.mulf %71, %72 : vector<8x128xf32>
    %74 = vector.broadcast %1 : vector<1x128xf32> to vector<8x128xf32>
    %75 = arith.addf %73, %74 : vector<8x128xf32>
    %cst_43 = arith.constant dense<0.000000e+00> : vector<16x128xf32>
    %76 = tpu.matmul %4, %75, %cst_43 {dimension_numbers = #tpu.dot_dimension_numbers<[1], [0], [0], [1], [0, 0, 1, 1], [], []>} : vector<16x8xf32>, vector<8x128xf32>, vector<16x128xf32> -> vector<16x128xf32>
    %77 = vector.broadcast %5 : vector<16x1xf32> to vector<16x128xf32>
    %78 = arith.addf %76, %77 : vector<16x128xf32>
    %cst_44 = arith.constant 5.000000e-01 : f32
    %79 = vector.broadcast %cst_44 : f32 to vector<16x128xf32>
    %80 = arith.mulf %79, %78 : vector<16x128xf32>
    %cst_45 = arith.constant 4.471500e-02 : f32
    %81 = vector.broadcast %cst_45 : f32 to vector<16x128xf32>
    %82 = arith.mulf %81, %78 : vector<16x128xf32>
    %83 = arith.mulf %82, %78 : vector<16x128xf32>
    %84 = arith.mulf %83, %78 : vector<16x128xf32>
    %85 = arith.addf %78, %84 : vector<16x128xf32>
    %cst_46 = arith.constant 0.797884583 : f32
    %86 = vector.broadcast %cst_46 : f32 to vector<16x128xf32>
    %87 = arith.mulf %86, %85 : vector<16x128xf32>
    %88 = math.tanh %87 : vector<16x128xf32>
    %cst_47 = arith.constant 1.000000e+00 : f32
    %89 = vector.broadcast %cst_47 : f32 to vector<16x128xf32>
    %90 = arith.addf %89, %88 : vector<16x128xf32>
    %91 = arith.mulf %80, %90 : vector<16x128xf32>
    %cst_48 = arith.constant dense<0.000000e+00> : vector<8x128xf32>
    %92 = tpu.matmul %6, %91, %cst_48 {dimension_numbers = #tpu.dot_dimension_numbers<[1], [0], [0], [1], [0, 0, 1, 1], [], []>} : vector<8x16xf32>, vector<16x128xf32>, vector<8x128xf32> -> vector<8x128xf32>
    %93 = vector.broadcast %7 : vector<8x1xf32> to vector<8x128xf32>
    %94 = arith.addf %92, %93 : vector<8x128xf32>
    %95 = arith.addf %94, %55 : vector<8x128xf32>
    %96 = tpu.concatenate %53, %95 in 0 : vector<8x128xf32>, vector<8x128xf32> -> vector<16x128xf32>
    %cst_49 = arith.constant dense<0.000000e+00> : vector<16xf32>
    %97 = vector.multi_reduction <add>, %96, %cst_49 [1] : vector<16x128xf32> to vector<16xf32>
    %98 = vector.shape_cast %97 : vector<16xf32> to vector<16x1xf32>
    %cst_50 = arith.constant 1.280000e+02 : f32
    %99 = vector.broadcast %cst_50 : f32 to vector<16x1xf32>
    %100 = arith.divf %98, %99 : vector<16x1xf32>
    %101 = vector.broadcast %100 : vector<16x1xf32> to vector<16x128xf32>
    %102 = arith.subf %96, %101 : vector<16x128xf32>
    %103 = arith.mulf %102, %102 : vector<16x128xf32>
    %cst_51 = arith.constant dense<0.000000e+00> : vector<16xf32>
    %104 = vector.multi_reduction <add>, %103, %cst_51 [1] : vector<16x128xf32> to vector<16xf32>
    %105 = vector.shape_cast %104 : vector<16xf32> to vector<16x1xf32>
    %cst_52 = arith.constant 1.280000e+02 : f32
    %106 = vector.broadcast %cst_52 : f32 to vector<16x1xf32>
    %107 = arith.divf %105, %106 : vector<16x1xf32>
    %cst_53 = arith.constant 9.99999974E-6 : f32
    %108 = vector.broadcast %cst_53 : f32 to vector<16x1xf32>
    %109 = arith.addf %107, %108 : vector<16x1xf32>
    %110 = math.rsqrt %109 : vector<16x1xf32>
    %111 = vector.broadcast %110 : vector<16x1xf32> to vector<16x128xf32>
    %112 = arith.mulf %102, %111 : vector<16x128xf32>
    %113 = vector.broadcast %2 : vector<1x128xf32> to vector<16x128xf32>
    %114 = arith.mulf %112, %113 : vector<16x128xf32>
    %115 = vector.broadcast %3 : vector<1x128xf32> to vector<16x128xf32>
    %116 = arith.addf %114, %115 : vector<16x128xf32>
    %cst_54 = arith.constant dense<0.000000e+00> : vector<16x256xf32>
    %117 = tpu.matmul %116, %8, %cst_54 {dimension_numbers = #tpu.dot_dimension_numbers<[1], [0], [0], [1], [0, 0, 1, 1], [], []>} : vector<16x128xf32>, vector<128x256xf32>, vector<16x256xf32> -> vector<16x256xf32>
    %118 = vector.broadcast %9 : vector<1x256xf32> to vector<16x256xf32>
    %119 = arith.addf %117, %118 : vector<16x256xf32>
    %cst_55 = arith.constant 5.000000e-01 : f32
    %120 = vector.broadcast %cst_55 : f32 to vector<16x256xf32>
    %121 = arith.mulf %120, %119 : vector<16x256xf32>
    %cst_56 = arith.constant 4.471500e-02 : f32
    %122 = vector.broadcast %cst_56 : f32 to vector<16x256xf32>
    %123 = arith.mulf %122, %119 : vector<16x256xf32>
    %124 = arith.mulf %123, %119 : vector<16x256xf32>
    %125 = arith.mulf %124, %119 : vector<16x256xf32>
    %126 = arith.addf %119, %125 : vector<16x256xf32>
    %cst_57 = arith.constant 0.797884583 : f32
    %127 = vector.broadcast %cst_57 : f32 to vector<16x256xf32>
    %128 = arith.mulf %127, %126 : vector<16x256xf32>
    %129 = math.tanh %128 : vector<16x256xf32>
    %cst_58 = arith.constant 1.000000e+00 : f32
    %130 = vector.broadcast %cst_58 : f32 to vector<16x256xf32>
    %131 = arith.addf %130, %129 : vector<16x256xf32>
    %132 = arith.mulf %121, %131 : vector<16x256xf32>
    %cst_59 = arith.constant dense<0.000000e+00> : vector<16x128xf32>
    %133 = tpu.matmul %132, %10, %cst_59 {dimension_numbers = #tpu.dot_dimension_numbers<[1], [0], [0], [1], [0, 0, 1, 1], [], []>} : vector<16x256xf32>, vector<256x128xf32>, vector<16x128xf32> -> vector<16x128xf32>
    %134 = vector.broadcast %11 : vector<1x128xf32> to vector<16x128xf32>
    %135 = arith.addf %133, %134 : vector<16x128xf32>
    %136 = arith.addf %135, %96 : vector<16x128xf32>
    %137 = vector.extract_strided_slice %136 {offsets = [0, 0], sizes = [8, 128], strides = [1, 1]} : vector<16x128xf32> to vector<8x128xf32>
    %c0_60 = arith.constant 0 : index
    %c0_61 = arith.constant 0 : index
    %c0_62 = arith.constant 0 : index
    %138 = vector.load %arg14[%c0_60, %c0_61, %c0_62] : memref<2x8x128xf32, #tpu.memory_space<vmem>>, vector<1x8x128xf32>
    %139 = vector.shape_cast %138 : vector<1x8x128xf32> to vector<8x128xf32>
    %140 = vector.shape_cast %137 : vector<8x128xf32> to vector<1x8x128xf32>
    tpu.vector_store %arg14[%c0_60, %c0_61, %c0_62], %140 {strides = array<i32>} : memref<2x8x128xf32, #tpu.memory_space<vmem>>, vector<1x8x128xf32>,
    %141 = vector.extract_strided_slice %136 {offsets = [8, 0], sizes = [8, 128], strides = [1, 1]} : vector<16x128xf32> to vector<8x128xf32>
    %c1_63 = arith.constant 1 : index
    %c0_64 = arith.constant 0 : index
    %c0_65 = arith.constant 0 : index
    %142 = vector.load %arg14[%c1_63, %c0_64, %c0_65] : memref<2x8x128xf32, #tpu.memory_space<vmem>>, vector<1x8x128xf32>
    %143 = vector.shape_cast %142 : vector<1x8x128xf32> to vector<8x128xf32>
    %144 = vector.shape_cast %141 : vector<8x128xf32> to vector<1x8x128xf32>
    tpu.vector_store %arg14[%c1_63, %c0_64, %c0_65], %144 {strides = array<i32>} : memref<2x8x128xf32, #tpu.memory_space<vmem>>, vector<1x8x128xf32>,
    return
  }
  func.func @transform_0(%arg0: i32) -> (i32, i32, i32) {
    %c0_i32 = arith.constant 0 : i32
    %c0_i32_0 = arith.constant 0 : i32
    %c0_i32_1 = arith.constant 0 : i32
    return %arg0, %c0_i32, %c0_i32_0 : i32, i32, i32
  }
  func.func @transform_1(%arg0: i32) -> (i32, i32) {
    %c0_i32 = arith.constant 0 : i32
    %c0_i32_0 = arith.constant 0 : i32
    %c0_i32_1 = arith.constant 0 : i32
    return %c0_i32, %c0_i32_0 : i32, i32
  }
  func.func @transform_2(%arg0: i32) -> (i32, i32) {
    %c0_i32 = arith.constant 0 : i32
    %c0_i32_0 = arith.constant 0 : i32
    %c0_i32_1 = arith.constant 0 : i32
    return %c0_i32, %c0_i32_0 : i32, i32
  }
  func.func @transform_3(%arg0: i32) -> (i32, i32) {
    %c0_i32 = arith.constant 0 : i32
    %c0_i32_0 = arith.constant 0 : i32
    %c0_i32_1 = arith.constant 0 : i32
    return %c0_i32, %c0_i32_0 : i32, i32
  }
  func.func @transform_4(%arg0: i32) -> (i32, i32) {
    %c0_i32 = arith.constant 0 : i32
    %c0_i32_0 = arith.constant 0 : i32
    %c0_i32_1 = arith.constant 0 : i32
    return %c0_i32, %c0_i32_0 : i32, i32
  }
  func.func @transform_5(%arg0: i32) -> (i32, i32) {
    %c0_i32 = arith.constant 0 : i32
    %c0_i32_0 = arith.constant 0 : i32
    %c0_i32_1 = arith.constant 0 : i32
    return %c0_i32, %c0_i32_0 : i32, i32
  }
  func.func @transform_6(%arg0: i32) -> (i32, i32) {
    %c0_i32 = arith.constant 0 : i32
    %c0_i32_0 = arith.constant 0 : i32
    %c0_i32_1 = arith.constant 0 : i32
    return %c0_i32, %c0_i32_0 : i32, i32
  }
  func.func @transform_7(%arg0: i32) -> (i32, i32) {
    %c0_i32 = arith.constant 0 : i32
    %c0_i32_0 = arith.constant 0 : i32
    %c0_i32_1 = arith.constant 0 : i32
    return %c0_i32, %c0_i32_0 : i32, i32
  }
  func.func @transform_8(%arg0: i32) -> (i32, i32) {
    %c0_i32 = arith.constant 0 : i32
    %c0_i32_0 = arith.constant 0 : i32
    %c0_i32_1 = arith.constant 0 : i32
    return %c0_i32, %c0_i32_0 : i32, i32
  }
  func.func @transform_9(%arg0: i32) -> (i32, i32) {
    %c0_i32 = arith.constant 0 : i32
    %c0_i32_0 = arith.constant 0 : i32
    %c0_i32_1 = arith.constant 0 : i32
    return %c0_i32, %c0_i32_0 : i32, i32
  }
  func.func @transform_10(%arg0: i32) -> (i32, i32) {
    %c0_i32 = arith.constant 0 : i32
    %c0_i32_0 = arith.constant 0 : i32
    %c0_i32_1 = arith.constant 0 : i32
    return %c0_i32, %c0_i32_0 : i32, i32
  }
  func.func @transform_11(%arg0: i32) -> (i32, i32) {
    %c0_i32 = arith.constant 0 : i32
    %c0_i32_0 = arith.constant 0 : i32
    %c0_i32_1 = arith.constant 0 : i32
    return %c0_i32, %c0_i32_0 : i32, i32
  }
  func.func @transform_12(%arg0: i32) -> (i32, i32) {
    %c0_i32 = arith.constant 0 : i32
    %c0_i32_0 = arith.constant 0 : i32
    %c0_i32_1 = arith.constant 0 : i32
    return %c0_i32, %c0_i32_0 : i32, i32
  }
  func.func @transform_13(%arg0: i32) -> (i32, i32, i32) {
    %c0_i32 = arith.constant 0 : i32
    %c0_i32_0 = arith.constant 0 : i32
    %c0_i32_1 = arith.constant 0 : i32
    return %arg0, %c0_i32, %c0_i32_0 : i32, i32, i32
  }
}

</mosaic_0001>

<bundles_post_ra>
// kernel: mixer_layer_forward.1
= control target key start
LH: loop header
LB: loop body
LE: loop exit
PB: predicated region body
PF: predicated region fallthrough
CT: control target
= control target key end

     0   :  { %s2036_s0 = inlined_call_operand.hbm [shape: f32[8,8,128], index: 0, kind: input, shape index: {}]   ;;  %s2037_s1 = inlined_call_operand.vmem [shape: f32[1,128], index: 1, kind: input, shape index: {}]   ;;  %s2038_s2 = inlined_call_operand.vmem [shape: f32[1,128], index: 2, kind: input, shape index: {}]   ;;  %s2039_s3 = inlined_call_operand.vmem [shape: f32[16,8], index: 3, kind: input, shape index: {}]   ;;  %s2040_s4 = inlined_call_operand.vmem [shape: f32[16,1], index: 4, kind: input, shape index: {}]   ;;  %s2041_s5 = inlined_call_operand.vmem [shape: f32[8,16], index: 5, kind: input, shape index: {}]   ;;  %s2042_s6 = inlined_call_operand.vmem [shape: f32[8,1], index: 6, kind: input, shape index: {}]   ;;  %s2043_s7 = inlined_call_operand.vmem [shape: f32[1,128], index: 7, kind: input, shape index: {}]   ;;  %s2044_s8 = inlined_call_operand.vmem [shape: f32[1,128], index: 8, kind: input, shape index: {}]   ;;  %s2045_s9 = inlined_call_operand.hbm [shape: f32[128,256], index: 9, kind: input, shape index: {}]   ;;  %s2046_s10 = inlined_call_operand.vmem [shape: f32[1,256], index: 10, kind: input, shape index: {}]   ;;  %s2047_s11 = inlined_call_operand.hbm [shape: f32[256,128], index: 11, kind: input, shape index: {}]   ;;  %s2048_s12 = inlined_call_operand.vmem [shape: f32[1,128], index: 12, kind: input, shape index: {}]   ;;  %s2049_s13 = inlined_call_operand.hbm [shape: f32[8,8,128], index: 13, kind: output, shape index: {}]  }
   0x1   :  { %2061 = sst [smem:[#allocation17_spill]] %s2045_s9 }
   0x2   :  { %2062 = sst [smem:[#allocation18_spill]] %s2047_s11 }
   0x3   :  { %18 = vsyncpa [#allocation3], 0 }
   0x4   :  { %20 = vsyncpa [#allocation3 + $0x1], 0 }
   0x5   :  { %21 = vsyncpa [#allocation6], 0 }
   0x6   :  { %22 = vsyncpa [#allocation4], 0 }
   0x7   :  { %24 = vsyncpa [#allocation4 + $0x1], 0  ;;  %s1758_s25 = smov 0   ;;  %s1760_s26 = smov 0  }
   0x8   :  { %s1762_s27 = smov 0   ;;  %s1764_s28 = smov 0  }
   0x9 LB: > { %2063 = sst [smem:[#allocation12_spill]] %s1661_s25  ;;  %s1779_s29 = sadd.s32 4294967295, %s1673_s28   ;;  %s1673_s28 = sphi %s1764_s28, %s2087_s28   ;;  %s1669_s27 = sphi %s1762_s27, %s2089_s27   ;;  %s1665_s26 = sphi %s1760_s26, %s2091_s26   ;;  %s1661_s25 = sphi %s1758_s25, %s2090_s25  }
   0xa   : > { %2064 = sst [smem:[#allocation13_spill]] %s1669_s27  ;;  %s1316_s30 = sadd.s32 4294967294, %s1673_s28  }
   0xb   : > { %p50_p0 = scmp.ne.s32.totalorder %s1665_s26, %s1661_s25  ;;  %p2050_p1 = scmp.eq.s32.totalorder %s1779_s29, 0 }
   0xc   : > { %p332_p3 = scmp.eq.s32.totalorder %s1316_s30, 3  ;;  %p1317_p5 = scmp.ge.s32.totalorder %s1673_s28, 1 }
   0xd   : > { %p1788_p4 = por %p2050_p1, %p50_p0  ;;  %p339_p7 = scmp.lt.s32.totalorder %s1673_s28, 5 }
   0xe   : > { %p1793_p6 = por %p332_p3, %p50_p0  ;;  %s1675_s17 = smov [#allocation5]  }
   0xf   : > { %s2065_s14 = scalar_select %p1788_p4, 1, 0 }
  0x10   : > { %s2066_s15 = scalar_select %p1793_p6, 1, 0 }
  0x11   : > { %p1798_p8 = pnand %p1317_p5, %p339_p7  ;;  %s375_s18 = sshll.u32 %s1675_s17, 4  ;;  %s376_s18 = int_to_ptr.vmem [resolvable:$true] %s375_s18 }
  0x12   : > { %2067 = sst [smem:[#allocation14_spill]] %s2066_s15  ;;  %s1676_s20 = smov [#allocation7]  }
  0x13   : > { %s2068_s16 = scalar_select %p1798_p8, 1, 0 }
  0x14   : > { %p1435_p9 = pneg %p1798_p8  ;;  %s391_s21 = sshll.u32 %s1676_s20, 4  ;;  %s392_s21 = int_to_ptr.vmem [resolvable:$true] %s391_s21 }
  0x15   : > { %s1536_s22 = scalar_lea.vmem %s376_s18, 4096  ;;  %p1544_p3 = scmp.lt.s32.totalorder %s376_s18, %s376_s18 }
  0x16   : > { %p1806_p10 = pnand %p1435_p9, %p2050_p1  ;;  %p1537_p12 = scmp.ne.s32.totalorder %s376_s18, %s1536_s22 }
  0x17   : > { %p1545_p5 = scmp.lt.s32.totalorder %s1536_s22, %s1536_s22 }
  0x18   : > { %p1527_p11 = pneg %p1806_p10 }
  0x19   : > { %p1546_p7 = por %p1545_p5, %p1544_p3 }
  0x1a   : > { %p1539_p13 = pnand %p1537_p12, %p1527_p11 }
  0x1c   : > { %p1540_p0 = pneg %p1539_p13 }
  0x1e   : > { %p1547_p9 = pnand %p1546_p7, %p1540_p0 }
  0x20   : > { %1550 = shalt.err (!%p1547_p9)
}
  0x21   : > { %s1677_s23 = smov 256   ;;  %s1678_s24 = smov 16  }
  0x22   : > { %s2070_s9 = sld [smem:[#allocation17_spill]]  ;;  %s1562_s20 = scalar_lea.vmem %s392_s21, 4096 }
  0x23   : > { %p1563_p1 = scmp.ne.s32.totalorder %s392_s21, %s1562_s20  ;;  %p1570_p2 = scmp.lt.s32.totalorder %s392_s21, %s392_s21 }
  0x24   : > { %p1571_p6 = scmp.lt.s32.totalorder %s1562_s20, %s1562_s20 }
  0x25   : > { %p1565_p12 = pnand %p1563_p1, %p1527_p11 }
  0x26   : > { %p1572_p3 = por %p1571_p6, %p1570_p2 }
  0x27   : > { %p1566_p13 = pneg %p1565_p12 }
  0x28   : > { %1438 = dma.hbm_to_vmem [thread:$0]  (!%p1806_p10), %s2070_s9, 4096, %s376_s18, [#allocation6], %s1677_s23, %s1677_s23, %s1678_s24  }
  0x29   : > { %p1573_p0 = pnand %p1572_p3, %p1566_p13 }
  0x2b   : > { %1576 = shalt.err (!%p1573_p0)
}
  0x2c   : > { %s2052_s22 = smov 128   ;;  %s2053_s18 = smov 8  }
  0x2d   : > { %s2071_s11 = sld [smem:[#allocation18_spill]]  ;;  %s1832_s30 = sadd.s32 1, %s1673_s28  }
  0x2e   : > { %2072 = sst [smem:[#allocation15_spill]] %s1832_s30  ;;  %s34_s17 = ssub.s32 %s1673_s28, %s1832_s30 }
  0x2f   : > { %p35_p1 = scmp.eq.s32.totalorder %s34_s17, 0  ;;  %s37_s20 = sadd.s32 1, %s1669_s27 }
  0x30   : > { %p44_p2 = scmp.ne.s32.totalorder %s1669_s27, %s1665_s26  ;;  %p45_p6 = scmp.eq.s32.totalorder %s1673_s28, 0 }
  0x31   : > { %s1841_s9 = scalar_select %p35_p1, %s1669_s27, %s37_s20  }
  0x32   : > { %p46_p11 = por %p45_p6, %p44_p2  ;;  %p2074_p5 = scmp.eq.s32.totalorder %s1779_s29, 3 }
  0x33   : > { %1441 = dma.hbm_to_vmem [thread:$0]  (!%p1806_p10), %s2071_s11, 4096, %s392_s21, [#allocation6], %s2052_s22, %s2052_s22, %s2053_s18  }
  0x34   : > { %2073 = sst [smem:[#allocation16_spill]] %s1841_s9  ;;  %p1845_p7 = por %p2074_p5, %p44_p2 }
  0x35   : > { %p1452_p9 = scmp.lt.s32.totalorder %s1673_s28, 4  ;;  %s408_s15 = sand.u32 1, %s1669_s27  }
  0x36   : > { %s2075_s19 = scalar_select %p1845_p7, 1, 0 }
  0x37   : > { %s1321_s23 = sshll.u32 %s408_s15, 4  ;;  %s1347_s21 = sshll.u32 %s1673_s28, 8 }
  0x38   : > { %s1855_s18 = scalar_lea.hbm %s2036_s0, %s1347_s21  ;;  %s412_s17 = scalar_lea.vmem [#allocation2], %s1321_s23 }
  0x39   : > { %s419_s20 = sshll.u32 %s412_s17, 4  ;;  %p1859_p10 = pnand %p1452_p9, %p46_p11  ;;  %s1857_s20 = int_to_ptr.vmem [resolvable:$true] %s419_s20 }
  0x3a   : > { %s1863_s9 = scalar_lea.sflag [#allocation3], %s408_s15  ;;  %s1577_s27 = scalar_lea.hbm %s1855_s18, 256 }
  0x3b   : > { %p1578_p12 = scmp.ne.s32.totalorder %s1855_s18, %s1577_s27  ;;  %p1579_p13 = pneg %p1859_p10 }
  0x3c   : > { %s1582_s23 = scalar_lea.hbm %s2036_s0, 1024  ;;  %p1583_p1 = scmp.lt.s32.totalorder %s1855_s18, %s2036_s0 }
  0x3d   : > { %p1580_p3 = pnand %p1579_p13, %p1578_p12  ;;  %p1584_p2 = scmp.lt.s32.totalorder %s1582_s23, %s1577_s27 }
  0x3f   : > { %p1581_p0 = pneg %p1580_p3  ;;  %p1585_p6 = por %p1584_p2, %p1583_p1 }
  0x41   : > { %p1586_p11 = pnand %p1585_p6, %p1581_p0 }
  0x43   : > { %1589 = shalt.err (!%p1586_p11)
}
  0x44   : > { %s1590_s15 = scalar_lea.vmem %s1857_s20, 256  ;;  %s1681_s30 = smov [#allocation2]  }
  0x45   : > { %p1591_p5 = scmp.ne.s32.totalorder %s1857_s20, %s1590_s15  ;;  %s1595_s25 = sshll.u32 %s1681_s30, 4  ;;  %s1596_s25 = int_to_ptr.vmem [resolvable:$false] %s1595_s25 }
  0x46   : > { %s1597_s22 = scalar_lea.vmem %s1596_s25, 512  ;;  %p1598_p3 = scmp.lt.s32.totalorder %s1857_s20, %s1596_s25 }
  0x47   : > { %p1593_p9 = pnand %p1591_p5, %p1579_p13  ;;  %p1599_p7 = scmp.lt.s32.totalorder %s1597_s22, %s1590_s15 }
  0x49   : > { %p1594_p12 = pneg %p1593_p9  ;;  %p1600_p4 = por %p1599_p7, %p1598_p3 }
  0x4b   : > { %p1601_p8 = pnand %p1600_p4, %p1594_p12 }
  0x4d   : > { %1604 = shalt.err (!%p1601_p8)
}
  0x4e   : > { %s2077_s27 = smov 8   ;;  %s2078_s21 = smov 128  }
  0x4f   : > { %1445 = dma.hbm_to_vmem [thread:$0]  (!%p1859_p10), %s1855_s18, 256, %s1857_s20, %s1863_s9, %s2078_s21, %s2078_s21, %s2077_s27  }
  0x50   : > { %p2079_p13 = scmp.ne.s32.totalorder %s2068_s16, 0 }
  0x51   : > { %s1890_s30 = sand.u32 (!%p2079_p13), 1, %s1665_s26   ;;  %p2080_p4 = scmp.ne.s32.totalorder (!%p2079_p13), %s2065_s14, 0 }
  0x52   : > { %431 = sbr.rel (%p2079_p13) target bundleno = 1574 (0x626), region = 72  ;;  %s1325_s25 = sshll.u32 (!%p2079_p13), %s1890_s30, 4 }
  0x53   : > { %s434_s23 = scalar_lea.sflag (!%p2079_p13), [#allocation3], %s1890_s30  ;;  %s437_s11 = scalar_lea.vmem (!%p2079_p13), [#allocation2], %s1325_s25 }
  0x57   : > { %1648 = dma.done.wait (%p2080_p4), %s434_s23, 256  }
  0x58   : > { %1650 = vsyncadd (%p2080_p4), %s434_s23, 4294967040  ;;  %p2081_p8 = scmp.eq.s32.totalorder %s1779_s29, 0 }
  0x5a   : > { %1652 = dma.done.wait (%p2081_p8), [#allocation6], 8192   ;;  %p2082_p7 = pmov %p2081_p8 }
  0x5b   : > { %v1904_v0 = vld [vmem:[%s437_s11] sm:$0xff]  ;;  %v1907_v1 = vld [vmem:[%s437_s11 + $0x8] sm:$0xff]  ;;  %vm603_vm0 = vcmask 64512   ;;  %v1682_v13 = vmov 0   ;;  %v1683_v32 = vmov 0.0   ;;  %vm1684_vm1 = vmmov 0  }
  0x5c   : > { %1654 = vsyncadd (%p2082_p7), [#allocation6], 4294959104  ;;  %567 = vadd.xlane.f32.xlu0 %v1904_v0  ;;  %v494_v10 = vld [vmem:[%s2039_s3] sm:$0xff]  ;;  %v497_v11 = vld [vmem:[%s2040_s4 + $0x8] sm:$0xff]  ;;  %1500 = vset.pattern.permute.xlu1 %v1682_v13  ;;  %vm708_vm2 = vcmask 130048   ;;  %s487_s23 = scalar_lea.vmem [#allocation8], %s1325_s25 }
  0x5d   : > { %1401 = vmatprep.mubr.msk.f32.mxu0 %vm603_vm0, %v494_v10  ;;  %v496_v12 = vld [vmem:[%s2040_s4] sm:$0xff]  ;;  %1499 = vset.pattern.permute.xlu0 %v1682_v13  ;;  %v495_v29 = vld [vmem:[%s2039_s3 + $0x8] sm:$0xff]  ;;  %s1224_s11 = sshll.u32 %s487_s23, 4  ;;  %s1348_s9 = sshll.u32 %s1779_s29, 8  ;;  %s1988_s11 = int_to_ptr.vmem [resolvable:$true] %s1224_s11 }
  0x5e   : > { %v499_v14 = vld [vmem:[%s2042_s6] sm:$0xff]  ;;  %1404 = vmatprep.subr.mxu1 %v1683_v32  ;;  %1408 = vmatprep.mubr.msk.f32.mxu1 %vm1684_vm1, %v1683_v32  ;;  %s1993_s18 = scalar_lea.hbm %s2049_s13, %s1348_s9  ;;  %s1211_s25 = scalar_lea.sflag [#allocation4], %s1890_s30 }
  0x5f   : > { %v1329_v22 = vld [vmem:[%s2037_s1] ss:$0 sm:$0xff]  ;;  %s1605_s20 = scalar_lea.vmem %s1988_s11, 256  ;;  %p2083_p0 = scmp.ne.s32.totalorder %s2075_s19, 0 }
  0x60   : > { %785 = vadd.xlane.f32.xlu0 %v1907_v1  ;;  %v1330_v24 = vld [vmem:[%s2038_s2] ss:$0 sm:$0xff]  ;;  %p1606_p10 = scmp.ne.s32.totalorder %s1988_s11, %s1605_s20  ;;  %s1685_s29 = smov [#allocation8]  }
  0x61   : > { %s1609_s24 = sshll.u32 %s1685_s29, 4  ;;  %s1610_s24 = int_to_ptr.vmem [resolvable:$false] %s1609_s24 }
  0x62   : > { %p1607_p1 = pnand %p1606_p10, %p2083_p0  ;;  %s1611_s17 = scalar_lea.vmem %s1610_s24, 512 }
  0x63   : > { %p1612_p6 = scmp.lt.s32.totalorder %s1988_s11, %s1610_s24  ;;  %p1613_p11 = scmp.lt.s32.totalorder %s1611_s17, %s1605_s20 }
  0x64   : > { %p1608_p2 = pneg %p1607_p1 }
  0x65   : > { %p1614_p5 = por %p1613_p11, %p1612_p6 }
  0x67   : > { %p1615_p9 = pnand %p1614_p5, %p1608_p2 }
  0x76   : > { %600 = vperm.xlu0 %1499, %v497_v11  }
  0xe5   : > { %v568_v2 = vpop.xlane.xlu0 %567 }
  0xe6   : > { %v570_v3 = vmul.f32 0.0078125, %v568_v2 }
  0xe8   : > { %v571_v4 = vsub.f32 %v1904_v0, %v570_v3 }
  0xe9   : > { %v786_v5 = vpop.xlane.xlu0 %785 }
  0xea   : > { %v787_v6 = vmul.f32 0.0078125, %v786_v5  ;;  %v572_v7 = vmul.f32 %v571_v4, %v571_v4 }
  0xec   : > { %v788_v8 = vsub.f32 %v1907_v1, %v787_v6  ;;  %573 = vadd.xlane.f32.xlu1 %v572_v7 }
  0xee   : > { %v789_v9 = vmul.f32 %v788_v8, %v788_v8 }
  0xf0   : > { %790 = vadd.xlane.f32.xlu1 %v789_v9 }
  0xf1   : > { %v601_v33 = vpop.permute.xlu0 %600 }
 0x101   : > { %595 = vperm.xlu1 %1500, %v496_v12  }
 0x105   : > { %705 = vperm.xlu1 %1500, %v499_v14  }
 0x175   : > { %v574_v15 = vpop.xlane.xlu1 %573 }
 0x176   : > { %v575_v16 = vmul.f32 0.0078125, %v574_v15 }
 0x178   : > { %v576_v17 = vadd.f32 1e-05, %v575_v16 }
 0x179   : > { %v791_v18 = vpop.xlane.xlu1 %790 }
 0x17a   : > { %1501 = vrsqrt.f32 %v576_v17  ;;  %v792_v19 = vmul.f32 0.0078125, %v791_v18 }
 0x17c   : > { %v793_v20 = vadd.f32 1e-05, %v792_v19 }
 0x17d   : > { %v596_v36 = vpop.permute.xlu1 %595 }
 0x17e   : > { %1503 = vrsqrt.f32 %v793_v20 }
 0x181   : > { %v706_v18 = vpop.permute.xlu1 %705 }
 0x187   : > { %v1502_v21 = vpop.eup %1501 }
 0x188   : > { %v578_v23 = vmul.f32 %v1502_v21, %v571_v4 }
 0x18a   : > { %v585_v25 = vmul.f32 %v1329_v22, %v578_v23 }
 0x18b   : > { %v1504_v26 = vpop.eup %1503 }
 0x18c   : > { %v592_v27 = vadd.f32 %v1330_v24, %v585_v25  ;;  %v795_v28 = vmul.f32 %v1504_v26, %v788_v8 }
 0x18e   : > { %1399 = vmatprep.subr.mxu0 %v592_v27  ;;  %v796_v30 = vmul.f32 %v1329_v22, %v795_v28  ;;  %v530_v28 = vld [vmem:[#allocation5 + $0xf0] sm:$0xff] }
 0x18f   : > { %1400 = vmatpush3.msra.mxu0 %v592_v27  ;;  %v531_v27 = vld [vmem:[#allocation5 + $0xf8] sm:$0xff] }
 0x190   : > { %v797_v31 = vadd.f32 %v1330_v24, %v796_v30  ;;  %1402 = vmatmul.mubr.msk.f32.vlgmr.msra.gmra.mxu0 %vm603_vm0, %v495_v29  ;;  %v528_v30 = vld [vmem:[#allocation5 + $0xe0] sm:$0xff] }
 0x191   : > { %1413 = vmatprep.mubr.msk.f32.mxu0 %vm603_vm0, %v494_v10  ;;  %v498_v10 = vld [vmem:[%s2041_s5] sm:$0xff] }
 0x192   : > { %1411 = vmatprep.subr.mxu0 %v797_v31 }
 0x193   : > { %1412 = vmatpush3.msra.mxu0 %v797_v31  ;;  %v527_v31 = vld [vmem:[#allocation5 + $0xd8] sm:$0xff] }
 0x194   : > { %1414 = vmatmul.mubr.msk.f32.vlgmr.msra.gmra.mxu0 %vm603_vm0, %v495_v29  ;;  %v529_v29 = vld [vmem:[#allocation5 + $0xe8] sm:$0xff]  ;;  %1011 = vmatprep.subr.mxu0 %v531_v27 }
 0x195   : > { %1075 = vmatprep.mubr.f32.mxu0 %v1683_v32  ;;  %1012 = vmatpush1.msra.mxu0 %v530_v28  ;;  %v546_v27 = vld [vmem:[#allocation7 + $0x68] sm:$0xff]  ;;  %v561_v28 = vld [vmem:[#allocation7 + $0xe0] sm:$0xff] }
 0x196   : > { %1013 = vmatprep.subr.mxu0 %v529_v29  ;;  %v545_v29 = vld [vmem:[#allocation7 + $0x60] sm:$0xff] }
 0x197   : > { %1014 = vmatpush1.msra.mxu0 %v528_v30  ;;  %v560_v30 = vld [vmem:[#allocation7 + $0xd8] sm:$0xff] }
 0x198   : > { %1015 = vmatprep.subr.mxu0 %v527_v31  ;;  %v559_v31 = vld [vmem:[#allocation7 + $0xd0] sm:$0xff] }
 0x250   : > { %v1403_v34 = vpop.f32.mrf.mxu0 }
 0x251   : > { %v682_v35 = vadd.f32 %v1403_v34, %v601_v33  ;;  %v524_v34 = vld [vmem:[#allocation5 + $0xc0] sm:$0xff] }
 0x252   : > { %v676_v37 = vpop.f32.mrf.mxu0 }
 0x253   : > { %v688_v38 = vmul.f32 0.044715, %v682_v35  ;;  %v677_v39 = vadd.f32 %v676_v37, %v596_v36  ;;  %v686_v2 = vmul.f32 0.5, %v682_v35 }
 0x254   : > { %v1415_v40 = vpop.f32.mrf.mxu0 }
 0x255   : > { %v687_v41 = vmul.f32 0.044715, %v677_v39  ;;  %v870_v42 = vadd.f32 %v1415_v40, %v601_v33  ;;  %v690_v43 = vmul.f32 %v688_v38, %v682_v35  ;;  %v685_v6 = vmul.f32 0.5, %v677_v39  ;;  %v525_v33 = vld [vmem:[#allocation5 + $0xc8] sm:$0xff] }
 0x256   : > { %v864_v44 = vpop.f32.mrf.mxu0 }
 0x257   : > { %v689_v45 = vmul.f32 %v687_v41, %v677_v39  ;;  %v876_v46 = vmul.f32 0.044715, %v870_v42  ;;  %v865_v47 = vadd.f32 %v864_v44, %v596_v36  ;;  %v692_v48 = vmul.f32 %v690_v43, %v682_v35  ;;  %v522_v43 = vld [vmem:[#allocation5 + $0xb0] sm:$0xff]  ;;  %v521_v44 = vld [vmem:[#allocation5 + $0xa8] sm:$0xff] }
 0x258   : > { %v874_v11 = vmul.f32 0.5, %v870_v42 }
 0x259   : > { %v878_v49 = vmul.f32 %v876_v46, %v870_v42  ;;  %v875_v50 = vmul.f32 0.044715, %v865_v47  ;;  %v694_v51 = vadd.f32 %v692_v48, %v682_v35  ;;  %v691_v52 = vmul.f32 %v689_v45, %v677_v39  ;;  %v520_v45 = vld [vmem:[#allocation5 + $0xa0] sm:$0xff]  ;;  %v519_v46 = vld [vmem:[#allocation5 + $0x98] sm:$0xff]  ;;  %v517_v48 = vld [vmem:[#allocation5 + $0x88] sm:$0xff] }
 0x25a   : > { %v873_v15 = vmul.f32 0.5, %v865_v47 }
 0x25b   : > { %v880_v53 = vmul.f32 %v878_v49, %v870_v42  ;;  %v877_v54 = vmul.f32 %v875_v50, %v865_v47  ;;  %v696_v55 = vmul.f32 0.7978846, %v694_v51  ;;  %v693_v56 = vadd.f32 %v691_v52, %v677_v39  ;;  %v516_v49 = vld [vmem:[#allocation5 + $0x80] sm:$0xff]  ;;  %v515_v50 = vld [vmem:[#allocation5 + $0x78] sm:$0xff]  ;;  %v514_v51 = vld [vmem:[#allocation5 + $0x70] sm:$0xff] }
 0x25c   : > { %v513_v52 = vld [vmem:[#allocation5 + $0x68] sm:$0xff] }
 0x25d   : > { %v882_v57 = vadd.f32 %v880_v53, %v870_v42  ;;  %v879_v58 = vmul.f32 %v877_v54, %v865_v47  ;;  %1505 = vtanh.f32 %v696_v55  ;;  %v695_v59 = vmul.f32 0.7978846, %v693_v56  ;;  %v523_v42 = vld [vmem:[#allocation5 + $0xb8] sm:$0xff]  ;;  %v512_v53 = vld [vmem:[#allocation5 + $0x60] sm:$0xff]  ;;  %v510_v55 = vld [vmem:[#allocation5 + $0x50] sm:$0xff] }
 0x25e   : > { %v511_v54 = vld [vmem:[#allocation5 + $0x58] sm:$0xff]  ;;  %v509_v56 = vld [vmem:[#allocation5 + $0x48] sm:$0xff] }
 0x25f   : > { %v881_v60 = vadd.f32 %v879_v58, %v865_v47  ;;  %1507 = vtanh.f32 %v695_v59  ;;  %v884_v61 = vmul.f32 0.7978846, %v882_v57  ;;  %v518_v47 = vld [vmem:[#allocation5 + $0x90] sm:$0xff]  ;;  %v508_v57 = vld [vmem:[#allocation5 + $0x40] sm:$0xff]  ;;  %v507_v58 = vld [vmem:[#allocation5 + $0x38] sm:$0xff] }
 0x260   : > { %v506_v59 = vld [vmem:[#allocation5 + $0x30] sm:$0xff] }
 0x261   : > { %1509 = vtanh.f32 %v884_v61  ;;  %v883_v62 = vmul.f32 0.7978846, %v881_v60  ;;  %v505_v60 = vld [vmem:[#allocation5 + $0x28] sm:$0xff]  ;;  %v504_v61 = vld [vmem:[#allocation5 + $0x20] sm:$0xff] }
 0x263   : > { %1511 = vtanh.f32 %v883_v62  ;;  %v503_v62 = vld [vmem:[#allocation5 + $0x18] sm:$0xff] }
 0x26a   : > { %v1506_v63 = vpop.eup %1505 }
 0x26b   : > { %v700_v3 = vadd.f32 1.0, %v1506_v63  ;;  %v502_v63 = vld [vmem:[#allocation5 + $0x10] sm:$0xff] }
 0x26c   : > { %v1508_v4 = vpop.eup %1507 }
 0x26d   : > { %v702_v5 = vmul.f32 %v700_v3, %v686_v2  ;;  %v699_v7 = vadd.f32 1.0, %v1508_v4  ;;  %v501_v2 = vld [vmem:[#allocation5 + $0x8] sm:$0xff]  ;;  %v500_v3 = vld [vmem:[#allocation5] sm:$0xff] }
 0x26e   : > { %v1510_v8 = vpop.eup %1509 }
 0x26f   : > { %1405 = vmatpush3.msra.mxu1 %v702_v5  ;;  %v701_v9 = vmul.f32 %v699_v7, %v685_v6  ;;  %v888_v12 = vadd.f32 1.0, %v1510_v8 }
 0x270   : > { %v1512_v13 = vpop.eup %1511  ;;  %1406 = vmatprep.subr.mxu1 %v1683_v32 }
 0x271   : > { %1407 = vmatpush3.msra.mxu1 %v701_v9  ;;  %v890_v14 = vmul.f32 %v888_v12, %v874_v11  ;;  %v887_v16 = vadd.f32 1.0, %v1512_v13  ;;  %v1338_v11 = vld [vmem:[%s2043_s7] ss:$0 sm:$0xff] }
 0x272   : > { %1409 = vmatmul.mubr.msk.f32.vlgmr.msra.gmra.mxu1 %vm708_vm2, %v498_v10  ;;  %1416 = vmatprep.subr.mxu1 %v1683_v32  ;;  %v1339_v13 = vld [vmem:[%s2044_s8] ss:$0 sm:$0xff] }
 0x273   : > { %1417 = vmatpush3.msra.mxu1 %v890_v14  ;;  %v889_v17 = vmul.f32 %v887_v16, %v873_v15  ;;  %1420 = vmatprep.mubr.msk.f32.mxu1 %vm1684_vm1, %v1683_v32 }
 0x274   : > { %1418 = vmatprep.subr.mxu1 %v1683_v32 }
 0x275   : > { %1419 = vmatpush3.msra.mxu1 %v889_v17 }
 0x276   : > { %1421 = vmatmul.mubr.msk.f32.vlgmr.msra.gmra.mxu1 %vm708_vm2, %v498_v10 }
 0x332   : > { %v778_v19 = vpop.f32.mrf.mxu1 }
 0x333   : > { %v779_v20 = vadd.f32 %v778_v19, %v706_v18 }
 0x334   : > { %v1410_v21 = vpop.f32.mrf.mxu1 }
 0x335   : > { %v1952_v22 = vadd.f32 %v779_v20, %v1904_v0  ;;  %v526_v0 = vld [vmem:[#allocation5 + $0xd0] sm:$0xff]  ;;  %v564_v20 = vld [vmem:[#allocation7 + $0xf8] sm:$0xff] }
 0x336   : > { %v957_v23 = vpop.f32.mrf.mxu1  ;;  %1016 = vmatpush1.msra.mxu0 %v526_v0  ;;  %1361 = vmatprep.subr.mxu1 %v564_v20  ;;  %v548_v21 = vld [vmem:[#allocation7 + $0x78] sm:$0xff]  ;;  %v543_v0 = vld [vmem:[#allocation7 + $0x50] sm:$0xff] }
 0x337   : > { %v958_v24 = vadd.f32 %v957_v23, %v706_v18  ;;  %962 = vadd.xlane.f32.xlu1 %v1952_v22  ;;  %1017 = vmatprep.subr.mxu0 %v525_v33  ;;  %v563_v23 = vld [vmem:[#allocation7 + $0xf0] sm:$0xff]  ;;  %v558_v33 = vld [vmem:[#allocation7 + $0xc8] sm:$0xff] }
 0x338   : > { %v1422_v25 = vpop.f32.mrf.mxu1  ;;  %1018 = vmatpush1.msra.mxu0 %v524_v34  ;;  %1362 = vmatpush3.msra.mxu1 %v548_v21  ;;  %v542_v34 = vld [vmem:[#allocation7 + $0x48] sm:$0xff] }
 0x339   : > { %v1956_v26 = vadd.f32 %v1907_v1, %v958_v24  ;;  %1019 = vmatprep.subr.mxu0 %v523_v42  ;;  %1363 = vmatprep.subr.mxu1 %v563_v23  ;;  %v547_v24 = vld [vmem:[#allocation7 + $0x70] sm:$0xff]  ;;  %v562_v25 = vld [vmem:[#allocation7 + $0xe8] sm:$0xff]  ;;  %v553_v42 = vld [vmem:[#allocation7 + $0xa0] sm:$0xff] }
 0x33a   : > { %1020 = vmatpush1.msra.mxu0 %v522_v43  ;;  %1364 = vmatpush3.msra.mxu1 %v547_v24  ;;  %v537_v43 = vld [vmem:[#allocation7 + $0x20] sm:$0xff] }
 0x33b   : > { %964 = vadd.xlane.f32.xlu0 %v1956_v26  ;;  %1021 = vmatprep.subr.mxu0 %v521_v44  ;;  %v552_v44 = vld [vmem:[#allocation7 + $0x98] sm:$0xff] }
 0x33c   : > { %1022 = vmatpush1.msra.mxu0 %v520_v45  ;;  %1365 = vmatprep.subr.mxu1 %v562_v25  ;;  %v536_v45 = vld [vmem:[#allocation7 + $0x18] sm:$0xff] }
 0x33d   : > { %1023 = vmatprep.subr.mxu0 %v519_v46  ;;  %1366 = vmatpush3.msra.mxu1 %v546_v27  ;;  %v551_v46 = vld [vmem:[#allocation7 + $0x90] sm:$0xff] }
 0x33e   : > { %1024 = vmatpush1.msra.mxu0 %v518_v47  ;;  %1367 = vmatprep.subr.mxu1 %v561_v28  ;;  %v535_v47 = vld [vmem:[#allocation7 + $0x10] sm:$0xff] }
 0x33f   : > { %1025 = vmatprep.subr.mxu0 %v517_v48  ;;  %1368 = vmatpush3.msra.mxu1 %v545_v29  ;;  %v550_v48 = vld [vmem:[#allocation7 + $0x88] sm:$0xff] }
 0x340   : > { %1026 = vmatpush1.msra.mxu0 %v516_v49  ;;  %1369 = vmatprep.subr.mxu1 %v560_v30  ;;  %v534_v49 = vld [vmem:[#allocation7 + $0x8] sm:$0xff] }
 0x341   : > { %1027 = vmatprep.subr.mxu0 %v515_v50  ;;  %v549_v50 = vld [vmem:[#allocation7 + $0x80] sm:$0xff] }
 0x342   : > { %1028 = vmatpush1.msra.mxu0 %v514_v51  ;;  %v533_v51 = vld [vmem:[#allocation7] sm:$0xff] }
 0x343   : > { %1029 = vmatprep.subr.mxu0 %v513_v52  ;;  %v1001_v52 = vlaneseq }
 0x344   : > { %1030 = vmatpush1.msra.mxu0 %v512_v53 }
 0x345   : > { %1031 = vmatprep.subr.mxu0 %v511_v54  ;;  %v1002_v53 = vshrl.u32 %v1001_v52, 7 }
 0x346   : > { %1032 = vmatpush1.msra.mxu0 %v510_v55  ;;  %v532_v55 = vld [vmem:[%s2046_s10] sm:$0x3] }
 0x347   : > { %1033 = vmatprep.subr.mxu0 %v509_v56  ;;  %v1003_v54 = vsub.s32 0, %v1002_v53  ;;  %v1007_v56 = vsub.s32 1, %v1002_v53 }
 0x348   : > { %1034 = vmatpush1.msra.mxu0 %v508_v57 }
 0x349   : > { %1035 = vmatprep.subr.mxu0 %v507_v58  ;;  %v1004_v57 = vrot.slane %v532_v55, %v1003_v54  ;;  %v1008_v58 = vrot.slane %v532_v55, %v1007_v56 }
 0x34a   : > { %1036 = vmatpush1.msra.mxu0 %v506_v59 }
 0x34b   : > { %1037 = vmatprep.subr.mxu0 %v505_v60 }
 0x34c   : > { %1038 = vmatpush1.msra.mxu0 %v504_v61 }
 0x34d   : > { %1039 = vmatprep.subr.mxu0 %v503_v62 }
 0x34e   : > { %1040 = vmatpush1.msra.mxu0 %v502_v63 }
 0x34f   : > { %1041 = vmatprep.subr.mxu0 %v501_v2 }
 0x350   : > { %1042 = vmatpush1.msra.mxu0 %v500_v3 }
 0x3c0   : > { %v963_v1 = vpop.xlane.xlu1 %962 }
 0x3c1   : > { %v966_v35 = vmul.f32 0.0078125, %v963_v1  ;;  %v557_v1 = vld [vmem:[#allocation7 + $0xc0] sm:$0xff] }
 0x3c3   : > { %v1960_v36 = vsub.f32 %v1952_v22, %v966_v35  ;;  %v541_v35 = vld [vmem:[#allocation7 + $0x40] sm:$0xff] }
 0x3c4   : > { %v965_v37 = vpop.xlane.xlu0 %964 }
 0x3c5   : > { %v967_v38 = vmul.f32 0.0078125, %v965_v37  ;;  %v970_v39 = vmul.f32 %v1960_v36, %v1960_v36  ;;  %v540_v37 = vld [vmem:[#allocation7 + $0x38] sm:$0xff] }
 0x3c7   : > { %v1965_v40 = vsub.f32 %v1956_v26, %v967_v38  ;;  %972 = vadd.xlane.f32.xlu1 %v970_v39  ;;  %v555_v38 = vld [vmem:[#allocation7 + $0xb0] sm:$0xff] }
 0x3c8   : > { %v539_v39 = vld [vmem:[#allocation7 + $0x30] sm:$0xff] }
 0x3c9   : > { %v971_v41 = vmul.f32 %v1965_v40, %v1965_v40 }
 0x3cb   : > { %974 = vadd.xlane.f32.xlu1 %v971_v41  ;;  %v538_v41 = vld [vmem:[#allocation7 + $0x28] sm:$0xff] }
 0x450   : > { %v973_v4 = vpop.xlane.xlu1 %972 }
 0x451   : > { %v976_v5 = vmul.f32 0.0078125, %v973_v4 }
 0x453   : > { %v978_v6 = vadd.f32 1e-05, %v976_v5 }
 0x454   : > { %v975_v7 = vpop.xlane.xlu1 %974 }
 0x455   : > { %1513 = vrsqrt.f32 %v978_v6  ;;  %v977_v8 = vmul.f32 0.0078125, %v975_v7 }
 0x457   : > { %v979_v9 = vadd.f32 1e-05, %v977_v8 }
 0x459   : > { %1515 = vrsqrt.f32 %v979_v9 }
 0x462   : > { %v1514_v10 = vpop.eup %1513 }
 0x463   : > { %v982_v12 = vmul.f32 %v1514_v10, %v1960_v36  ;;  %v556_v36 = vld [vmem:[#allocation7 + $0xb8] sm:$0xff] }
 0x465   : > { %v990_v14 = vmul.f32 %v1338_v11, %v982_v12 }
 0x466   : > { %v1516_v15 = vpop.eup %1515 }
 0x467   : > { %v998_v16 = vadd.f32 %v1339_v13, %v990_v14  ;;  %v983_v17 = vmul.f32 %v1516_v15, %v1965_v40  ;;  %v554_v40 = vld [vmem:[#allocation7 + $0xa8] sm:$0xff] }
 0x469   : > { %1076 = vmatmul.mubr.f32.vlgmr.msra.gmra.mxu0 %v998_v16  ;;  %v991_v18 = vmul.f32 %v1338_v11, %v983_v17 }
 0x46a   : > { %1081 = vmatprep.mubr.f32.mxu0 %v1683_v32  ;;  %v544_v32 = vld [vmem:[#allocation7 + $0x58] sm:$0xff] }
 0x46b   : > { %v999_v19 = vadd.f32 %v1339_v13, %v991_v18  ;;  %1370 = vmatpush3.msra.mxu1 %v544_v32 }
 0x46c   : > { %1371 = vmatprep.subr.mxu1 %v559_v31 }
 0x46d   : > { %1082 = vmatmul.mubr.f32.gmra.mxu0 %v999_v19  ;;  %1372 = vmatpush3.msra.mxu1 %v543_v0 }
 0x46e   : > { %1373 = vmatprep.subr.mxu1 %v558_v33 }
 0x46f   : > { %1374 = vmatpush3.msra.mxu1 %v542_v34 }
 0x470   : > { %1375 = vmatprep.subr.mxu1 %v557_v1 }
 0x471   : > { %1376 = vmatpush3.msra.mxu1 %v541_v35 }
 0x472   : > { %1377 = vmatprep.subr.mxu1 %v556_v36 }
 0x473   : > { %1378 = vmatpush3.msra.mxu1 %v540_v37 }
 0x474   : > { %1379 = vmatprep.subr.mxu1 %v555_v38 }
 0x475   : > { %1380 = vmatpush3.msra.mxu1 %v539_v39 }
 0x476   : > { %1381 = vmatprep.subr.mxu1 %v554_v40 }
 0x477   : > { %1382 = vmatpush3.msra.mxu1 %v538_v41 }
 0x478   : > { %1383 = vmatprep.subr.mxu1 %v553_v42  ;;  %v1340_v42 = vld [vmem:[%s2048_s12] ss:$0 sm:$0xff] }
 0x479   : > { %1384 = vmatpush3.msra.mxu1 %v537_v43 }
 0x47a   : > { %1385 = vmatprep.subr.mxu1 %v552_v44 }
 0x47b   : > { %1386 = vmatpush3.msra.mxu1 %v536_v45 }
 0x47c   : > { %1387 = vmatprep.subr.mxu1 %v551_v46 }
 0x47d   : > { %1388 = vmatpush3.msra.mxu1 %v535_v47 }
 0x47e   : > { %1389 = vmatprep.subr.mxu1 %v550_v48 }
 0x47f   : > { %1390 = vmatpush3.msra.mxu1 %v534_v49 }
 0x480   : > { %1391 = vmatprep.subr.mxu1 %v549_v50 }
 0x481   : > { %1392 = vmatpush3.msra.mxu1 %v533_v51 }
 0x529   : > { %v1077_v59 = vpop.f32.mrf.mxu0 }
 0x52a   : > { %v1078_v60 = vadd.f32 %v1077_v59, %v1004_v57 }
 0x52b   : > { %v1079_v61 = vpop.f32.mrf.mxu0 }
 0x52c   : > { %v1092_v62 = vmul.f32 0.044715, %v1078_v60  ;;  %v1080_v63 = vadd.f32 %v1079_v61, %v1008_v58  ;;  %v1088_v0 = vmul.f32 0.5, %v1078_v60 }
 0x52d   : > { %v1083_v2 = vpop.f32.mrf.mxu0 }
 0x52e   : > { %v1096_v3 = vmul.f32 %v1092_v62, %v1078_v60  ;;  %v1093_v4 = vmul.f32 0.044715, %v1080_v63  ;;  %v1084_v5 = vadd.f32 %v1083_v2, %v1004_v57  ;;  %v1089_v30 = vmul.f32 0.5, %v1080_v63 }
 0x52f   : > { %v1085_v6 = vpop.f32.mrf.mxu0 }
 0x530   : > { %v1100_v7 = vmul.f32 %v1096_v3, %v1078_v60  ;;  %v1097_v8 = vmul.f32 %v1093_v4, %v1080_v63  ;;  %v1094_v9 = vmul.f32 0.044715, %v1084_v5  ;;  %v1086_v10 = vadd.f32 %v1085_v6, %v1008_v58 }
 0x531   : > { %v1090_v38 = vmul.f32 0.5, %v1084_v5 }
 0x532   : > { %v1104_v11 = vadd.f32 %v1100_v7, %v1078_v60  ;;  %v1098_v12 = vmul.f32 %v1094_v9, %v1084_v5  ;;  %v1095_v13 = vmul.f32 0.044715, %v1086_v10  ;;  %v1101_v14 = vmul.f32 %v1097_v8, %v1080_v63 }
 0x533   : > { %v1091_v36 = vmul.f32 0.5, %v1086_v10 }
 0x534   : > { %v1099_v15 = vmul.f32 %v1095_v13, %v1086_v10  ;;  %v1105_v16 = vadd.f32 %v1101_v14, %v1080_v63  ;;  %v1108_v17 = vmul.f32 0.7978846, %v1104_v11  ;;  %v1102_v18 = vmul.f32 %v1098_v12, %v1084_v5 }
 0x536   : > { %v1109_v19 = vmul.f32 0.7978846, %v1105_v16  ;;  %1517 = vtanh.f32 %v1108_v17  ;;  %v1103_v20 = vmul.f32 %v1099_v15, %v1086_v10  ;;  %v1106_v21 = vadd.f32 %v1102_v18, %v1084_v5 }
 0x538   : > { %1519 = vtanh.f32 %v1109_v19  ;;  %v1107_v23 = vadd.f32 %v1103_v20, %v1086_v10  ;;  %v1110_v24 = vmul.f32 0.7978846, %v1106_v21 }
 0x53a   : > { %v1111_v25 = vmul.f32 0.7978846, %v1107_v23  ;;  %1521 = vtanh.f32 %v1110_v24 }
 0x53c   : > { %1523 = vtanh.f32 %v1111_v25 }
 0x543   : > { %v1518_v27 = vpop.eup %1517 }
 0x544   : > { %v1116_v29 = vadd.f32 1.0, %v1518_v27 }
 0x545   : > { %v1520_v28 = vpop.eup %1519 }
 0x546   : > { %v1117_v32 = vadd.f32 1.0, %v1520_v28  ;;  %v1120_v1 = vmul.f32 %v1116_v29, %v1088_v0 }
 0x547   : > { %v1522_v31 = vpop.eup %1521 }
 0x548   : > { %v1121_v33 = vmul.f32 %v1117_v32, %v1089_v30  ;;  %v1118_v35 = vadd.f32 1.0, %v1522_v31 }
 0x549   : > { %v1524_v34 = vpop.eup %1523 }
 0x54a   : > { %1194 = vmatprep.mubr.f32.mxu1 %v1121_v33  ;;  %v1119_v37 = vadd.f32 1.0, %v1524_v34  ;;  %v1122_v40 = vmul.f32 %v1118_v35, %v1090_v38 }
 0x54b   : > { %1195 = vmatmul.mubr.f32.vlgmr.msra.gmra.mxu1 %v1120_v1 }
 0x54c   : > { %v1123_v39 = vmul.f32 %v1119_v37, %v1091_v36 }
 0x54e   : > { %1199 = vmatprep.mubr.f32.mxu1 %v1123_v39 }
 0x54f   : > { %1200 = vmatmul.mubr.f32.gmra.mxu1 %v1122_v40 }
 0x60b   : > { %v1393_v41 = vpop.f32.mrf.mxu1 }
 0x60d   : > { %v1394_v43 = vpop.f32.mrf.mxu1 }
 0x60e   : > { %v1395_v44 = vadd.f32 %v1394_v43, %v1393_v41 }
 0x60f   : > { %v1396_v45 = vpop.f32.mrf.mxu1 }
 0x610   : > { %v1197_v46 = vadd.f32 %v1395_v44, %v1340_v42 }
 0x611   : > { %v1397_v47 = vpop.f32.mrf.mxu1 }
 0x612   : > { %v1205_v48 = vadd.f32 %v1197_v46, %v1952_v22  ;;  %v1398_v49 = vadd.f32 %v1397_v47, %v1396_v45 }
 0x614   : > { %1207 = vst [vmem:[%s487_s23] sm:$0xff] %v1205_v48  ;;  %v1202_v50 = vadd.f32 %v1398_v49, %v1340_v42 }
 0x616   : > { %v1206_v51 = vadd.f32 %v1202_v50, %v1956_v26 }
 0x618   : > { %1341 = vst [vmem:[%s487_s23 + $0x8] sm:$0xff] %v1206_v51 }
 0x619   : > { %1618 = shalt.err (!%p1615_p9)
}
 0x61a   : > { %s1619_s15 = scalar_lea.hbm %s1993_s18, 256  ;;  %s1623_s21 = scalar_lea.hbm %s2049_s13, 1024 }
 0x61b   : > { %p1620_p12 = scmp.ne.s32.totalorder %s1993_s18, %s1619_s15  ;;  %p1624_p4 = scmp.lt.s32.totalorder %s1993_s18, %s2049_s13 }
 0x61c   : > { %p1625_p8 = scmp.lt.s32.totalorder %s1623_s21, %s1619_s15 }
 0x61d   : > { %p1621_p3 = pnand %p1620_p12, %p2083_p0 }
 0x61e   : > { %p1626_p7 = por %p1625_p8, %p1624_p4 }
 0x61f   : > { %p1622_p13 = pneg %p1621_p3 }
 0x621   : > { %p1627_p10 = pnand %p1626_p7, %p1622_p13 }
 0x623   : > { %1630 = shalt.err (!%p1627_p10)
}
 0x624   : > { %s1686_s14 = smov 128   ;;  %s1687_s16 = smov 8  }
 0x625   : > { %1433 = dma.vmem_to_hbm [thread:$0]  (%p2083_p0), %s1988_s11, 256, %s1993_s18, %s1211_s25, %s1686_s14, %s1686_s14, %s1687_s16  }
 0x626 PF: > { %s2084_s20 = sld [smem:[#allocation12_spill]]  ;;  %p1455_p1 = scmp.ge.s32.totalorder %s1673_s28, 2 }
 0x627   : > { %s2085_s29 = sld [smem:[#allocation14_spill]] }
 0x62c   : > { %s1239_s24 = sand.u32 1, %s2084_s20  }
 0x62d   : > { %p2086_p2 = scmp.ne.s32.totalorder %s2085_s29, 0  ;;  %s1240_s17 = scalar_lea.sflag [#allocation4], %s1239_s24 }
 0x62f   : > { %p1447_p6 = pnand %p1455_p1, %p2086_p2 }
 0x631   : > { %p1448_p11 = pneg %p1447_p6 }
 0x633   : > { %1656 = dma.done.wait (%p1448_p11), %s1240_s17, 256  }
 0x634   : > { %1658 = vsyncadd (%p1448_p11), %s1240_s17, 4294967040  ;;  %s2087_s28 = sld [smem:[#allocation15_spill]]  ;;  %s2090_s25 = smov %s1665_s26 }
 0x635   : > { %s2088_s15 = sld [smem:[#allocation13_spill]] }
 0x636   : > { %s2089_s27 = sld [smem:[#allocation16_spill]] }
 0x63a   : > { %p27_p5 = scmp.ge.s32.totalorder %s2087_s28, 6  }
 0x63b   : > { %s2091_s26 = smov %s2088_s15 }
 0x63c   :  { %29 = sbr.rel (!%p27_p5) target bundleno = 9 (0x9), region = 127 }
 0x641   :  { %1245 = vsyncpa [#allocation3], 1 }
 0x642   :  { %1247 = vsyncpa [#allocation3 + $0x1], 1 }
 0x643   :  { %1248 = vsyncpa [#allocation6], 1 }
 0x644   :  { %1249 = vsyncpa [#allocation4], 1 }
 0x645   :  { %1251 = vsyncpa [#allocation4 + $0x1], 1 }

// kernel: mixer_layer_forward.1
= control target key start
LH: loop header
LB: loop body
LE: loop exit
PB: predicated region body
PF: predicated region fallthrough
CT: control target
= control target key end

     0   :  { %s2036_s0 = inlined_call_operand.hbm [shape: f32[8,8,128], index: 0, kind: input, shape index: {}]   ;;  %s2037_s1 = inlined_call_operand.vmem [shape: f32[1,128], index: 1, kind: input, shape index: {}]   ;;  %s2038_s2 = inlined_call_operand.vmem [shape: f32[1,128], index: 2, kind: input, shape index: {}]   ;;  %s2039_s3 = inlined_call_operand.vmem [shape: f32[16,8], index: 3, kind: input, shape index: {}]   ;;  %s2040_s4 = inlined_call_operand.vmem [shape: f32[16,1], index: 4, kind: input, shape index: {}]   ;;  %s2041_s5 = inlined_call_operand.vmem [shape: f32[8,16], index: 5, kind: input, shape index: {}]   ;;  %s2042_s6 = inlined_call_operand.vmem [shape: f32[8,1], index: 6, kind: input, shape index: {}]   ;;  %s2043_s7 = inlined_call_operand.vmem [shape: f32[1,128], index: 7, kind: input, shape index: {}]   ;;  %s2044_s8 = inlined_call_operand.vmem [shape: f32[1,128], index: 8, kind: input, shape index: {}]   ;;  %s2045_s9 = inlined_call_operand.hbm [shape: f32[128,256], index: 9, kind: input, shape index: {}]   ;;  %s2046_s10 = inlined_call_operand.vmem [shape: f32[1,256], index: 10, kind: input, shape index: {}]   ;;  %s2047_s11 = inlined_call_operand.hbm [shape: f32[256,128], index: 11, kind: input, shape index: {}]   ;;  %s2048_s12 = inlined_call_operand.vmem [shape: f32[1,128], index: 12, kind: input, shape index: {}]   ;;  %s2049_s13 = inlined_call_operand.hbm [shape: f32[8,8,128], index: 13, kind: output, shape index: {}]  }
   0x1   :  { %2061 = sst [smem:[#allocation17_spill]] %s2045_s9 }
   0x2   :  { %2062 = sst [smem:[#allocation18_spill]] %s2047_s11 }
   0x3   :  { %18 = vsyncpa [#allocation3], 0 }
   0x4   :  { %20 = vsyncpa [#allocation3 + $0x1], 0 }
   0x5   :  { %21 = vsyncpa [#allocation6], 0 }
   0x6   :  { %22 = vsyncpa [#allocation4], 0 }
   0x7   :  { %24 = vsyncpa [#allocation4 + $0x1], 0  ;;  %s1758_s25 = smov 0   ;;  %s1760_s26 = smov 0  }
   0x8   :  { %s1762_s27 = smov 0   ;;  %s1764_s28 = smov 0  }
   0x9 LB: > { %2063 = sst [smem:[#allocation12_spill]] %s1661_s25  ;;  %s1779_s29 = sadd.s32 4294967295, %s1673_s28   ;;  %s1673_s28 = sphi %s1764_s28, %s2087_s28   ;;  %s1669_s27 = sphi %s1762_s27, %s2089_s27   ;;  %s1665_s26 = sphi %s1760_s26, %s2091_s26   ;;  %s1661_s25 = sphi %s1758_s25, %s2090_s25  }
   0xa   : > { %2064 = sst [smem:[#allocation13_spill]] %s1669_s27  ;;  %s1316_s30 = sadd.s32 4294967294, %s1673_s28  }
   0xb   : > { %p50_p0 = scmp.ne.s32.totalorder %s1665_s26, %s1661_s25  ;;  %p2050_p1 = scmp.eq.s32.totalorder %s1779_s29, 0 }
   0xc   : > { %p332_p3 = scmp.eq.s32.totalorder %s1316_s30, 3  ;;  %p1317_p5 = scmp.ge.s32.totalorder %s1673_s28, 1 }
   0xd   : > { %p1788_p4 = por %p2050_p1, %p50_p0  ;;  %p339_p7 = scmp.lt.s32.totalorder %s1673_s28, 5 }
   0xe   : > { %p1793_p6 = por %p332_p3, %p50_p0  ;;  %s1675_s17 = smov [#allocation5]  }
   0xf   : > { %s2065_s14 = scalar_select %p1788_p4, 1, 0 }
  0x10   : > { %s2066_s15 = scalar_select %p1793_p6, 1, 0 }
  0x11   : > { %p1798_p8 = pnand %p1317_p5, %p339_p7  ;;  %s375_s18 = sshll.u32 %s1675_s17, 4  ;;  %s376_s18 = int_to_ptr.vmem [resolvable:$true] %s375_s18 }
  0x12   : > { %2067 = sst [smem:[#allocation14_spill]] %s2066_s15  ;;  %s1676_s20 = smov [#allocation7]  }
  0x13   : > { %s2068_s16 = scalar_select %p1798_p8, 1, 0 }
  0x14   : > { %p1435_p9 = pneg %p1798_p8  ;;  %s391_s21 = sshll.u32 %s1676_s20, 4  ;;  %s392_s21 = int_to_ptr.vmem [resolvable:$true] %s391_s21 }
  0x15   : > { %s1536_s22 = scalar_lea.vmem %s376_s18, 4096  ;;  %p1544_p3 = scmp.lt.s32.totalorder %s376_s18, %s376_s18 }
  0x16   : > { %p1806_p10 = pnand %p1435_p9, %p2050_p1  ;;  %p1537_p12 = scmp.ne.s32.totalorder %s376_s18, %s1536_s22 }
  0x17   : > { %p1545_p5 = scmp.lt.s32.totalorder %s1536_s22, %s1536_s22 }
  0x18   : > { %p1527_p11 = pneg %p1806_p10 }
  0x19   : > { %p1546_p7 = por %p1545_p5, %p1544_p3 }
  0x1a   : > { %p1539_p13 = pnand %p1537_p12, %p1527_p11 }
  0x1c   : > { %p1540_p0 = pneg %p1539_p13 }
  0x1e   : > { %p1547_p9 = pnand %p1546_p7, %p1540_p0 }
  0x20   : > { %1550 = shalt.err (!%p1547_p9)
}
  0x21   : > { %s1677_s23 = smov 256   ;;  %s1678_s24 = smov 16  }
  0x22   : > { %s2070_s9 = sld [smem:[#allocation17_spill]]  ;;  %s1562_s20 = scalar_lea.vmem %s392_s21, 4096 }
  0x23   : > { %p1563_p1 = scmp.ne.s32.totalorder %s392_s21, %s1562_s20  ;;  %p1570_p2 = scmp.lt.s32.totalorder %s392_s21, %s392_s21 }
  0x24   : > { %p1571_p6 = scmp.lt.s32.totalorder %s1562_s20, %s1562_s20 }
  0x25   : > { %p1565_p12 = pnand %p1563_p1, %p1527_p11 }
  0x26   : > { %p1572_p3 = por %p1571_p6, %p1570_p2 }
  0x27   : > { %p1566_p13 = pneg %p1565_p12 }
  0x28   : > { %1438 = dma.hbm_to_vmem [thread:$0]  (!%p1806_p10), %s2070_s9, 4096, %s376_s18, [#allocation6], %s1677_s23, %s1677_s23, %s1678_s24  }
  0x29   : > { %p1573_p0 = pnand %p1572_p3, %p1566_p13 }
  0x2b   : > { %1576 = shalt.err (!%p1573_p0)
}
  0x2c   : > { %s2052_s22 = smov 128   ;;  %s2053_s18 = smov 8  }
  0x2d   : > { %s2071_s11 = sld [smem:[#allocation18_spill]]  ;;  %s1832_s30 = sadd.s32 1, %s1673_s28  }
  0x2e   : > { %2072 = sst [smem:[#allocation15_spill]] %s1832_s30  ;;  %s34_s17 = ssub.s32 %s1673_s28, %s1832_s30 }
  0x2f   : > { %p35_p1 = scmp.eq.s32.totalorder %s34_s17, 0  ;;  %s37_s20 = sadd.s32 1, %s1669_s27 }
  0x30   : > { %p44_p2 = scmp.ne.s32.totalorder %s1669_s27, %s1665_s26  ;;  %p45_p6 = scmp.eq.s32.totalorder %s1673_s28, 0 }
  0x31   : > { %s1841_s9 = scalar_select %p35_p1, %s1669_s27, %s37_s20  }
  0x32   : > { %p46_p11 = por %p45_p6, %p44_p2  ;;  %p2074_p5 = scmp.eq.s32.totalorder %s1779_s29, 3 }
  0x33   : > { %1441 = dma.hbm_to_vmem [thread:$0]  (!%p1806_p10), %s2071_s11, 4096, %s392_s21, [#allocation6], %s2052_s22, %s2052_s22, %s2053_s18  }
  0x34   : > { %2073 = sst [smem:[#allocation16_spill]] %s1841_s9  ;;  %p1845_p7 = por %p2074_p5, %p44_p2 }
  0x35   : > { %p1452_p9 = scmp.lt.s32.totalorder %s1673_s28, 4  ;;  %s408_s15 = sand.u32 1, %s1669_s27  }
  0x36   : > { %s2075_s19 = scalar_select %p1845_p7, 1, 0 }
  0x37   : > { %s1321_s23 = sshll.u32 %s408_s15, 4  ;;  %s1347_s21 = sshll.u32 %s1673_s28, 8 }
  0x38   : > { %s1855_s18 = scalar_lea.hbm %s2036_s0, %s1347_s21  ;;  %s412_s17 = scalar_lea.vmem [#allocation2], %s1321_s23 }
  0x39   : > { %s419_s20 = sshll.u32 %s412_s17, 4  ;;  %p1859_p10 = pnand %p1452_p9, %p46_p11  ;;  %s1857_s20 = int_to_ptr.vmem [resolvable:$true] %s419_s20 }
  0x3a   : > { %s1863_s9 = scalar_lea.sflag [#allocation3], %s408_s15  ;;  %s1577_s27 = scalar_lea.hbm %s1855_s18, 256 }
  0x3b   : > { %p1578_p12 = scmp.ne.s32.totalorder %s1855_s18, %s1577_s27  ;;  %p1579_p13 = pneg %p1859_p10 }
  0x3c   : > { %s1582_s23 = scalar_lea.hbm %s2036_s0, 1024  ;;  %p1583_p1 = scmp.lt.s32.totalorder %s1855_s18, %s2036_s0 }
  0x3d   : > { %p1580_p3 = pnand %p1579_p13, %p1578_p12  ;;  %p1584_p2 = scmp.lt.s32.totalorder %s1582_s23, %s1577_s27 }
  0x3f   : > { %p1581_p0 = pneg %p1580_p3  ;;  %p1585_p6 = por %p1584_p2, %p1583_p1 }
  0x41   : > { %p1586_p11 = pnand %p1585_p6, %p1581_p0 }
  0x43   : > { %1589 = shalt.err (!%p1586_p11)
}
  0x44   : > { %s1590_s15 = scalar_lea.vmem %s1857_s20, 256  ;;  %s1681_s30 = smov [#allocation2]  }
  0x45   : > { %p1591_p5 = scmp.ne.s32.totalorder %s1857_s20, %s1590_s15  ;;  %s1595_s25 = sshll.u32 %s1681_s30, 4  ;;  %s1596_s25 = int_to_ptr.vmem [resolvable:$false] %s1595_s25 }
  0x46   : > { %s1597_s22 = scalar_lea.vmem %s1596_s25, 512  ;;  %p1598_p3 = scmp.lt.s32.totalorder %s1857_s20, %s1596_s25 }
  0x47   : > { %p1593_p9 = pnand %p1591_p5, %p1579_p13  ;;  %p1599_p7 = scmp.lt.s32.totalorder %s1597_s22, %s1590_s15 }
  0x49   : > { %p1594_p12 = pneg %p1593_p9  ;;  %p1600_p4 = por %p1599_p7, %p1598_p3 }
  0x4b   : > { %p1601_p8 = pnand %p1600_p4, %p1594_p12 }
  0x4d   : > { %1604 = shalt.err (!%p1601_p8)
}
  0x4e   : > { %s2077_s27 = smov 8   ;;  %s2078_s21 = smov 128  }
  0x4f   : > { %1445 = dma.hbm_to_vmem [thread:$0]  (!%p1859_p10), %s1855_s18, 256, %s1857_s20, %s1863_s9, %s2078_s21, %s2078_s21, %s2077_s27  }
  0x50   : > { %p2079_p13 = scmp.ne.s32.totalorder %s2068_s16, 0 }
  0x51   : > { %s1890_s30 = sand.u32 (!%p2079_p13), 1, %s1665_s26   ;;  %p2080_p4 = scmp.ne.s32.totalorder (!%p2079_p13), %s2065_s14, 0 }
  0x52   : > { %431 = sbr.rel (%p2079_p13) target bundleno = 1574 (0x626), region = 72  ;;  %s1325_s25 = sshll.u32 (!%p2079_p13), %s1890_s30, 4 }
  0x53   : > { %s434_s23 = scalar_lea.sflag (!%p2079_p13), [#allocation3], %s1890_s30  ;;  %s437_s11 = scalar_lea.vmem (!%p2079_p13), [#allocation2], %s1325_s25 }
  0x57   : > { %1648 = dma.done.wait (%p2080_p4), %s434_s23, 256  }
  0x58   : > { %1650 = vsyncadd (%p2080_p4), %s434_s23, 4294967040  ;;  %p2081_p8 = scmp.eq.s32.totalorder %s1779_s29, 0 }
  0x5a   : > { %1652 = dma.done.wait (%p2081_p8), [#allocation6], 8192   ;;  %p2082_p7 = pmov %p2081_p8 }
  0x5b   : > { %v1904_v0 = vld [vmem:[%s437_s11] sm:$0xff]  ;;  %v1907_v1 = vld [vmem:[%s437_s11 + $0x8] sm:$0xff]  ;;  %vm603_vm0 = vcmask 64512   ;;  %v1682_v13 = vmov 0   ;;  %v1683_v32 = vmov 0.0   ;;  %vm1684_vm1 = vmmov 0  }
  0x5c   : > { %1654 = vsyncadd (%p2082_p7), [#allocation6], 4294959104  ;;  %567 = vadd.xlane.f32.xlu0 %v1904_v0  ;;  %v494_v10 = vld [vmem:[%s2039_s3] sm:$0xff]  ;;  %v497_v11 = vld [vmem:[%s2040_s4 + $0x8] sm:$0xff]  ;;  %1500 = vset.pattern.permute.xlu1 %v1682_v13  ;;  %vm708_vm2 = vcmask 130048   ;;  %s487_s23 = scalar_lea.vmem [#allocation8], %s1325_s25 }
  0x5d   : > { %1401 = vmatprep.mubr.msk.f32.mxu0 %vm603_vm0, %v494_v10  ;;  %v496_v12 = vld [vmem:[%s2040_s4] sm:$0xff]  ;;  %1499 = vset.pattern.permute.xlu0 %v1682_v13  ;;  %v495_v29 = vld [vmem:[%s2039_s3 + $0x8] sm:$0xff]  ;;  %s1224_s11 = sshll.u32 %s487_s23, 4  ;;  %s1348_s9 = sshll.u32 %s1779_s29, 8  ;;  %s1988_s11 = int_to_ptr.vmem [resolvable:$true] %s1224_s11 }
  0x5e   : > { %v499_v14 = vld [vmem:[%s2042_s6] sm:$0xff]  ;;  %1404 = vmatprep.subr.mxu1 %v1683_v32  ;;  %1408 = vmatprep.mubr.msk.f32.mxu1 %vm1684_vm1, %v1683_v32  ;;  %s1993_s18 = scalar_lea.hbm %s2049_s13, %s1348_s9  ;;  %s1211_s25 = scalar_lea.sflag [#allocation4], %s1890_s30 }
  0x5f   : > { %v1329_v22 = vld [vmem:[%s2037_s1] ss:$0 sm:$0xff]  ;;  %s1605_s20 = scalar_lea.vmem %s1988_s11, 256  ;;  %p2083_p0 = scmp.ne.s32.totalorder %s2075_s19, 0 }
  0x60   : > { %785 = vadd.xlane.f32.xlu0 %v1907_v1  ;;  %v1330_v24 = vld [vmem:[%s2038_s2] ss:$0 sm:$0xff]  ;;  %p1606_p10 = scmp.ne.s32.totalorder %s1988_s11, %s1605_s20  ;;  %s1685_s29 = smov [#allocation8]  }
  0x61   : > { %s1609_s24 = sshll.u32 %s1685_s29, 4  ;;  %s1610_s24 = int_to_ptr.vmem [resolvable:$false] %s1609_s24 }
  0x62   : > { %p1607_p1 = pnand %p1606_p10, %p2083_p0  ;;  %s1611_s17 = scalar_lea.vmem %s1610_s24, 512 }
  0x63   : > { %p1612_p6 = scmp.lt.s32.totalorder %s1988_s11, %s1610_s24  ;;  %p1613_p11 = scmp.lt.s32.totalorder %s1611_s17, %s1605_s20 }
  0x64   : > { %p1608_p2 = pneg %p1607_p1 }
  0x65   : > { %p1614_p5 = por %p1613_p11, %p1612_p6 }
  0x67   : > { %p1615_p9 = pnand %p1614_p5, %p1608_p2 }
  0x76   : > { %600 = vperm.xlu0 %1499, %v497_v11  }
  0xe5   : > { %v568_v2 = vpop.xlane.xlu0 %567 }
  0xe6   : > { %v570_v3 = vmul.f32 0.0078125, %v568_v2 }
  0xe8   : > { %v571_v4 = vsub.f32 %v1904_v0, %v570_v3 }
  0xe9   : > { %v786_v5 = vpop.xlane.xlu0 %785 }
  0xea   : > { %v787_v6 = vmul.f32 0.0078125, %v786_v5  ;;  %v572_v7 = vmul.f32 %v571_v4, %v571_v4 }
  0xec   : > { %v788_v8 = vsub.f32 %v1907_v1, %v787_v6  ;;  %573 = vadd.xlane.f32.xlu1 %v572_v7 }
  0xee   : > { %v789_v9 = vmul.f32 %v788_v8, %v788_v8 }
  0xf0   : > { %790 = vadd.xlane.f32.xlu1 %v789_v9 }
  0xf1   : > { %v601_v33 = vpop.permute.xlu0 %600 }
 0x101   : > { %595 = vperm.xlu1 %1500, %v496_v12  }
 0x105   : > { %705 = vperm.xlu1 %1500, %v499_v14  }
 0x175   : > { %v574_v15 = vpop.xlane.xlu1 %573 }
 0x176   : > { %v575_v16 = vmul.f32 0.0078125, %v574_v15 }
 0x178   : > { %v576_v17 = vadd.f32 1e-05, %v575_v16 }
 0x179   : > { %v791_v18 = vpop.xlane.xlu1 %790 }
 0x17a   : > { %1501 = vrsqrt.f32 %v576_v17  ;;  %v792_v19 = vmul.f32 0.0078125, %v791_v18 }
 0x17c   : > { %v793_v20 = vadd.f32 1e-05, %v792_v19 }
 0x17d   : > { %v596_v36 = vpop.permute.xlu1 %595 }
 0x17e   : > { %1503 = vrsqrt.f32 %v793_v20 }
 0x181   : > { %v706_v18 = vpop.permute.xlu1 %705 }
 0x187   : > { %v1502_v21 = vpop.eup %1501 }
 0x188   : > { %v578_v23 = vmul.f32 %v1502_v21, %v571_v4 }
 0x18a   : > { %v585_v25 = vmul.f32 %v1329_v22, %v578_v23 }
 0x18b   : > { %v1504_v26 = vpop.eup %1503 }
 0x18c   : > { %v592_v27 = vadd.f32 %v1330_v24, %v585_v25  ;;  %v795_v28 = vmul.f32 %v1504_v26, %v788_v8 }
 0x18e   : > { %1399 = vmatprep.subr.mxu0 %v592_v27  ;;  %v796_v30 = vmul.f32 %v1329_v22, %v795_v28  ;;  %v530_v28 = vld [vmem:[#allocation5 + $0xf0] sm:$0xff] }
 0x18f   : > { %1400 = vmatpush3.msra.mxu0 %v592_v27  ;;  %v531_v27 = vld [vmem:[#allocation5 + $0xf8] sm:$0xff] }
 0x190   : > { %v797_v31 = vadd.f32 %v1330_v24, %v796_v30  ;;  %1402 = vmatmul.mubr.msk.f32.vlgmr.msra.gmra.mxu0 %vm603_vm0, %v495_v29  ;;  %v528_v30 = vld [vmem:[#allocation5 + $0xe0] sm:$0xff] }
 0x191   : > { %1413 = vmatprep.mubr.msk.f32.mxu0 %vm603_vm0, %v494_v10  ;;  %v498_v10 = vld [vmem:[%s2041_s5] sm:$0xff] }
 0x192   : > { %1411 = vmatprep.subr.mxu0 %v797_v31 }
 0x193   : > { %1412 = vmatpush3.msra.mxu0 %v797_v31  ;;  %v527_v31 = vld [vmem:[#allocation5 + $0xd8] sm:$0xff] }
 0x194   : > { %1414 = vmatmul.mubr.msk.f32.vlgmr.msra.gmra.mxu0 %vm603_vm0, %v495_v29  ;;  %v529_v29 = vld [vmem:[#allocation5 + $0xe8] sm:$0xff]  ;;  %1011 = vmatprep.subr.mxu0 %v531_v27 }
 0x195   : > { %1075 = vmatprep.mubr.f32.mxu0 %v1683_v32  ;;  %1012 = vmatpush1.msra.mxu0 %v530_v28  ;;  %v546_v27 = vld [vmem:[#allocation7 + $0x68] sm:$0xff]  ;;  %v561_v28 = vld [vmem:[#allocation7 + $0xe0] sm:$0xff] }
 0x196   : > { %1013 = vmatprep.subr.mxu0 %v529_v29  ;;  %v545_v29 = vld [vmem:[#allocation7 + $0x60] sm:$0xff] }
 0x197   : > { %1014 = vmatpush1.msra.mxu0 %v528_v30  ;;  %v560_v30 = vld [vmem:[#allocation7 + $0xd8] sm:$0xff] }
 0x198   : > { %1015 = vmatprep.subr.mxu0 %v527_v31  ;;  %v559_v31 = vld [vmem:[#allocation7 + $0xd0] sm:$0xff] }
 0x250   : > { %v1403_v34 = vpop.f32.mrf.mxu0 }
 0x251   : > { %v682_v35 = vadd.f32 %v1403_v34, %v601_v33  ;;  %v524_v34 = vld [vmem:[#allocation5 + $0xc0] sm:$0xff] }
 0x252   : > { %v676_v37 = vpop.f32.mrf.mxu0 }
 0x253   : > { %v688_v38 = vmul.f32 0.044715, %v682_v35  ;;  %v677_v39 = vadd.f32 %v676_v37, %v596_v36  ;;  %v686_v2 = vmul.f32 0.5, %v682_v35 }
 0x254   : > { %v1415_v40 = vpop.f32.mrf.mxu0 }
 0x255   : > { %v687_v41 = vmul.f32 0.044715, %v677_v39  ;;  %v870_v42 = vadd.f32 %v1415_v40, %v601_v33  ;;  %v690_v43 = vmul.f32 %v688_v38, %v682_v35  ;;  %v685_v6 = vmul.f32 0.5, %v677_v39  ;;  %v525_v33 = vld [vmem:[#allocation5 + $0xc8] sm:$0xff] }
 0x256   : > { %v864_v44 = vpop.f32.mrf.mxu0 }
 0x257   : > { %v689_v45 = vmul.f32 %v687_v41, %v677_v39  ;;  %v876_v46 = vmul.f32 0.044715, %v870_v42  ;;  %v865_v47 = vadd.f32 %v864_v44, %v596_v36  ;;  %v692_v48 = vmul.f32 %v690_v43, %v682_v35  ;;  %v522_v43 = vld [vmem:[#allocation5 + $0xb0] sm:$0xff]  ;;  %v521_v44 = vld [vmem:[#allocation5 + $0xa8] sm:$0xff] }
 0x258   : > { %v874_v11 = vmul.f32 0.5, %v870_v42 }
 0x259   : > { %v878_v49 = vmul.f32 %v876_v46, %v870_v42  ;;  %v875_v50 = vmul.f32 0.044715, %v865_v47  ;;  %v694_v51 = vadd.f32 %v692_v48, %v682_v35  ;;  %v691_v52 = vmul.f32 %v689_v45, %v677_v39  ;;  %v520_v45 = vld [vmem:[#allocation5 + $0xa0] sm:$0xff]  ;;  %v519_v46 = vld [vmem:[#allocation5 + $0x98] sm:$0xff]  ;;  %v517_v48 = vld [vmem:[#allocation5 + $0x88] sm:$0xff] }
 0x25a   : > { %v873_v15 = vmul.f32 0.5, %v865_v47 }
 0x25b   : > { %v880_v53 = vmul.f32 %v878_v49, %v870_v42  ;;  %v877_v54 = vmul.f32 %v875_v50, %v865_v47  ;;  %v696_v55 = vmul.f32 0.7978846, %v694_v51  ;;  %v693_v56 = vadd.f32 %v691_v52, %v677_v39  ;;  %v516_v49 = vld [vmem:[#allocation5 + $0x80] sm:$0xff]  ;;  %v515_v50 = vld [vmem:[#allocation5 + $0x78] sm:$0xff]  ;;  %v514_v51 = vld [vmem:[#allocation5 + $0x70] sm:$0xff] }
 0x25c   : > { %v513_v52 = vld [vmem:[#allocation5 + $0x68] sm:$0xff] }
 0x25d   : > { %v882_v57 = vadd.f32 %v880_v53, %v870_v42  ;;  %v879_v58 = vmul.f32 %v877_v54, %v865_v47  ;;  %1505 = vtanh.f32 %v696_v55  ;;  %v695_v59 = vmul.f32 0.7978846, %v693_v56  ;;  %v523_v42 = vld [vmem:[#allocation5 + $0xb8] sm:$0xff]  ;;  %v512_v53 = vld [vmem:[#allocation5 + $0x60] sm:$0xff]  ;;  %v510_v55 = vld [vmem:[#allocation5 + $0x50] sm:$0xff] }
 0x25e   : > { %v511_v54 = vld [vmem:[#allocation5 + $0x58] sm:$0xff]  ;;  %v509_v56 = vld [vmem:[#allocation5 + $0x48] sm:$0xff] }
 0x25f   : > { %v881_v60 = vadd.f32 %v879_v58, %v865_v47  ;;  %1507 = vtanh.f32 %v695_v59  ;;  %v884_v61 = vmul.f32 0.7978846, %v882_v57  ;;  %v518_v47 = vld [vmem:[#allocation5 + $0x90] sm:$0xff]  ;;  %v508_v57 = vld [vmem:[#allocation5 + $0x40] sm:$0xff]  ;;  %v507_v58 = vld [vmem:[#allocation5 + $0x38] sm:$0xff] }
 0x260   : > { %v506_v59 = vld [vmem:[#allocation5 + $0x30] sm:$0xff] }
 0x261   : > { %1509 = vtanh.f32 %v884_v61  ;;  %v883_v62 = vmul.f32 0.7978846, %v881_v60  ;;  %v505_v60 = vld [vmem:[#allocation5 + $0x28] sm:$0xff]  ;;  %v504_v61 = vld [vmem:[#allocation5 + $0x20] sm:$0xff] }
 0x263   : > { %1511 = vtanh.f32 %v883_v62  ;;  %v503_v62 = vld [vmem:[#allocation5 + $0x18] sm:$0xff] }
 0x26a   : > { %v1506_v63 = vpop.eup %1505 }
 0x26b   : > { %v700_v3 = vadd.f32 1.0, %v1506_v63  ;;  %v502_v63 = vld [vmem:[#allocation5 + $0x10] sm:$0xff] }
 0x26c   : > { %v1508_v4 = vpop.eup %1507 }
 0x26d   : > { %v702_v5 = vmul.f32 %v700_v3, %v686_v2  ;;  %v699_v7 = vadd.f32 1.0, %v1508_v4  ;;  %v501_v2 = vld [vmem:[#allocation5 + $0x8] sm:$0xff]  ;;  %v500_v3 = vld [vmem:[#allocation5] sm:$0xff] }
 0x26e   : > { %v1510_v8 = vpop.eup %1509 }
 0x26f   : > { %1405 = vmatpush3.msra.mxu1 %v702_v5  ;;  %v701_v9 = vmul.f32 %v699_v7, %v685_v6  ;;  %v888_v12 = vadd.f32 1.0, %v1510_v8 }
 0x270   : > { %v1512_v13 = vpop.eup %1511  ;;  %1406 = vmatprep.subr.mxu1 %v1683_v32 }
 0x271   : > { %1407 = vmatpush3.msra.mxu1 %v701_v9  ;;  %v890_v14 = vmul.f32 %v888_v12, %v874_v11  ;;  %v887_v16 = vadd.f32 1.0, %v1512_v13  ;;  %v1338_v11 = vld [vmem:[%s2043_s7] ss:$0 sm:$0xff] }
 0x272   : > { %1409 = vmatmul.mubr.msk.f32.vlgmr.msra.gmra.mxu1 %vm708_vm2, %v498_v10  ;;  %1416 = vmatprep.subr.mxu1 %v1683_v32  ;;  %v1339_v13 = vld [vmem:[%s2044_s8] ss:$0 sm:$0xff] }
 0x273   : > { %1417 = vmatpush3.msra.mxu1 %v890_v14  ;;  %v889_v17 = vmul.f32 %v887_v16, %v873_v15  ;;  %1420 = vmatprep.mubr.msk.f32.mxu1 %vm1684_vm1, %v1683_v32 }
 0x274   : > { %1418 = vmatprep.subr.mxu1 %v1683_v32 }
 0x275   : > { %1419 = vmatpush3.msra.mxu1 %v889_v17 }
 0x276   : > { %1421 = vmatmul.mubr.msk.f32.vlgmr.msra.gmra.mxu1 %vm708_vm2, %v498_v10 }
 0x332   : > { %v778_v19 = vpop.f32.mrf.mxu1 }
 0x333   : > { %v779_v20 = vadd.f32 %v778_v19, %v706_v18 }
 0x334   : > { %v1410_v21 = vpop.f32.mrf.mxu1 }
 0x335   : > { %v1952_v22 = vadd.f32 %v779_v20, %v1904_v0  ;;  %v526_v0 = vld [vmem:[#allocation5 + $0xd0] sm:$0xff]  ;;  %v564_v20 = vld [vmem:[#allocation7 + $0xf8] sm:$0xff] }
 0x336   : > { %v957_v23 = vpop.f32.mrf.mxu1  ;;  %1016 = vmatpush1.msra.mxu0 %v526_v0  ;;  %1361 = vmatprep.subr.mxu1 %v564_v20  ;;  %v548_v21 = vld [vmem:[#allocation7 + $0x78] sm:$0xff]  ;;  %v543_v0 = vld [vmem:[#allocation7 + $0x50] sm:$0xff] }
 0x337   : > { %v958_v24 = vadd.f32 %v957_v23, %v706_v18  ;;  %962 = vadd.xlane.f32.xlu1 %v1952_v22  ;;  %1017 = vmatprep.subr.mxu0 %v525_v33  ;;  %v563_v23 = vld [vmem:[#allocation7 + $0xf0] sm:$0xff]  ;;  %v558_v33 = vld [vmem:[#allocation7 + $0xc8] sm:$0xff] }
 0x338   : > { %v1422_v25 = vpop.f32.mrf.mxu1  ;;  %1018 = vmatpush1.msra.mxu0 %v524_v34  ;;  %1362 = vmatpush3.msra.mxu1 %v548_v21  ;;  %v542_v34 = vld [vmem:[#allocation7 + $0x48] sm:$0xff] }
 0x339   : > { %v1956_v26 = vadd.f32 %v1907_v1, %v958_v24  ;;  %1019 = vmatprep.subr.mxu0 %v523_v42  ;;  %1363 = vmatprep.subr.mxu1 %v563_v23  ;;  %v547_v24 = vld [vmem:[#allocation7 + $0x70] sm:$0xff]  ;;  %v562_v25 = vld [vmem:[#allocation7 + $0xe8] sm:$0xff]  ;;  %v553_v42 = vld [vmem:[#allocation7 + $0xa0] sm:$0xff] }
 0x33a   : > { %1020 = vmatpush1.msra.mxu0 %v522_v43  ;;  %1364 = vmatpush3.msra.mxu1 %v547_v24  ;;  %v537_v43 = vld [vmem:[#allocation7 + $0x20] sm:$0xff] }
 0x33b   : > { %964 = vadd.xlane.f32.xlu0 %v1956_v26  ;;  %1021 = vmatprep.subr.mxu0 %v521_v44  ;;  %v552_v44 = vld [vmem:[#allocation7 + $0x98] sm:$0xff] }
 0x33c   : > { %1022 = vmatpush1.msra.mxu0 %v520_v45  ;;  %1365 = vmatprep.subr.mxu1 %v562_v25  ;;  %v536_v45 = vld [vmem:[#allocation7 + $0x18] sm:$0xff] }
 0x33d   : > { %1023 = vmatprep.subr.mxu0 %v519_v46  ;;  %1366 = vmatpush3.msra.mxu1 %v546_v27  ;;  %v551_v46 = vld [vmem:[#allocation7 + $0x90] sm:$0xff] }
 0x33e   : > { %1024 = vmatpush1.msra.mxu0 %v518_v47  ;;  %1367 = vmatprep.subr.mxu1 %v561_v28  ;;  %v535_v47 = vld [vmem:[#allocation7 + $0x10] sm:$0xff] }
 0x33f   : > { %1025 = vmatprep.subr.mxu0 %v517_v48  ;;  %1368 = vmatpush3.msra.mxu1 %v545_v29  ;;  %v550_v48 = vld [vmem:[#allocation7 + $0x88] sm:$0xff] }
 0x340   : > { %1026 = vmatpush1.msra.mxu0 %v516_v49  ;;  %1369 = vmatprep.subr.mxu1 %v560_v30  ;;  %v534_v49 = vld [vmem:[#allocation7 + $0x8] sm:$0xff] }
 0x341   : > { %1027 = vmatprep.subr.mxu0 %v515_v50  ;;  %v549_v50 = vld [vmem:[#allocation7 + $0x80] sm:$0xff] }
 0x342   : > { %1028 = vmatpush1.msra.mxu0 %v514_v51  ;;  %v533_v51 = vld [vmem:[#allocation7] sm:$0xff] }
 0x343   : > { %1029 = vmatprep.subr.mxu0 %v513_v52  ;;  %v1001_v52 = vlaneseq }
 0x344   : > { %1030 = vmatpush1.msra.mxu0 %v512_v53 }
 0x345   : > { %1031 = vmatprep.subr.mxu0 %v511_v54  ;;  %v1002_v53 = vshrl.u32 %v1001_v52, 7 }
 0x346   : > { %1032 = vmatpush1.msra.mxu0 %v510_v55  ;;  %v532_v55 = vld [vmem:[%s2046_s10] sm:$0x3] }
 0x347   : > { %1033 = vmatprep.subr.mxu0 %v509_v56  ;;  %v1003_v54 = vsub.s32 0, %v1002_v53  ;;  %v1007_v56 = vsub.s32 1, %v1002_v53 }
 0x348   : > { %1034 = vmatpush1.msra.mxu0 %v508_v57 }
 0x349   : > { %1035 = vmatprep.subr.mxu0 %v507_v58  ;;  %v1004_v57 = vrot.slane %v532_v55, %v1003_v54  ;;  %v1008_v58 = vrot.slane %v532_v55, %v1007_v56 }
 0x34a   : > { %1036 = vmatpush1.msra.mxu0 %v506_v59 }
 0x34b   : > { %1037 = vmatprep.subr.mxu0 %v505_v60 }
 0x34c   : > { %1038 = vmatpush1.msra.mxu0 %v504_v61 }
 0x34d   : > { %1039 = vmatprep.subr.mxu0 %v503_v62 }
 0x34e   : > { %1040 = vmatpush1.msra.mxu0 %v502_v63 }
 0x34f   : > { %1041 = vmatprep.subr.mxu0 %v501_v2 }
 0x350   : > { %1042 = vmatpush1.msra.mxu0 %v500_v3 }
 0x3c0   : > { %v963_v1 = vpop.xlane.xlu1 %962 }
 0x3c1   : > { %v966_v35 = vmul.f32 0.0078125, %v963_v1  ;;  %v557_v1 = vld [vmem:[#allocation7 + $0xc0] sm:$0xff] }
 0x3c3   : > { %v1960_v36 = vsub.f32 %v1952_v22, %v966_v35  ;;  %v541_v35 = vld [vmem:[#allocation7 + $0x40] sm:$0xff] }
 0x3c4   : > { %v965_v37 = vpop.xlane.xlu0 %964 }
 0x3c5   : > { %v967_v38 = vmul.f32 0.0078125, %v965_v37  ;;  %v970_v39 = vmul.f32 %v1960_v36, %v1960_v36  ;;  %v540_v37 = vld [vmem:[#allocation7 + $0x38] sm:$0xff] }
 0x3c7   : > { %v1965_v40 = vsub.f32 %v1956_v26, %v967_v38  ;;  %972 = vadd.xlane.f32.xlu1 %v970_v39  ;;  %v555_v38 = vld [vmem:[#allocation7 + $0xb0] sm:$0xff] }
 0x3c8   : > { %v539_v39 = vld [vmem:[#allocation7 + $0x30] sm:$0xff] }
 0x3c9   : > { %v971_v41 = vmul.f32 %v1965_v40, %v1965_v40 }
 0x3cb   : > { %974 = vadd.xlane.f32.xlu1 %v971_v41  ;;  %v538_v41 = vld [vmem:[#allocation7 + $0x28] sm:$0xff] }
 0x450   : > { %v973_v4 = vpop.xlane.xlu1 %972 }
 0x451   : > { %v976_v5 = vmul.f32 0.0078125, %v973_v4 }
 0x453   : > { %v978_v6 = vadd.f32 1e-05, %v976_v5 }
 0x454   : > { %v975_v7 = vpop.xlane.xlu1 %974 }
 0x455   : > { %1513 = vrsqrt.f32 %v978_v6  ;;  %v977_v8 = vmul.f32 0.0078125, %v975_v7 }
 0x457   : > { %v979_v9 = vadd.f32 1e-05, %v977_v8 }
 0x459   : > { %1515 = vrsqrt.f32 %v979_v9 }
 0x462   : > { %v1514_v10 = vpop.eup %1513 }
 0x463   : > { %v982_v12 = vmul.f32 %v1514_v10, %v1960_v36  ;;  %v556_v36 = vld [vmem:[#allocation7 + $0xb8] sm:$0xff] }
 0x465   : > { %v990_v14 = vmul.f32 %v1338_v11, %v982_v12 }
 0x466   : > { %v1516_v15 = vpop.eup %1515 }
 0x467   : > { %v998_v16 = vadd.f32 %v1339_v13, %v990_v14  ;;  %v983_v17 = vmul.f32 %v1516_v15, %v1965_v40  ;;  %v554_v40 = vld [vmem:[#allocation7 + $0xa8] sm:$0xff] }
 0x469   : > { %1076 = vmatmul.mubr.f32.vlgmr.msra.gmra.mxu0 %v998_v16  ;;  %v991_v18 = vmul.f32 %v1338_v11, %v983_v17 }
 0x46a   : > { %1081 = vmatprep.mubr.f32.mxu0 %v1683_v32  ;;  %v544_v32 = vld [vmem:[#allocation7 + $0x58] sm:$0xff] }
 0x46b   : > { %v999_v19 = vadd.f32 %v1339_v13, %v991_v18  ;;  %1370 = vmatpush3.msra.mxu1 %v544_v32 }
 0x46c   : > { %1371 = vmatprep.subr.mxu1 %v559_v31 }
 0x46d   : > { %1082 = vmatmul.mubr.f32.gmra.mxu0 %v999_v19  ;;  %1372 = vmatpush3.msra.mxu1 %v543_v0 }
 0x46e   : > { %1373 = vmatprep.subr.mxu1 %v558_v33 }
 0x46f   : > { %1374 = vmatpush3.msra.mxu1 %v542_v34 }
 0x470   : > { %1375 = vmatprep.subr.mxu1 %v557_v1 }
 0x471   : > { %1376 = vmatpush3.msra.mxu1 %v541_v35 }
 0x472   : > { %1377 = vmatprep.subr.mxu1 %v556_v36 }
 0x473   : > { %1378 = vmatpush3.msra.mxu1 %v540_v37 }
 0x474   : > { %1379 = vmatprep.subr.mxu1 %v555_v38 }
 0x475   : > { %1380 = vmatpush3.msra.mxu1 %v539_v39 }
 0x476   : > { %1381 = vmatprep.subr.mxu1 %v554_v40 }
 0x477   : > { %1382 = vmatpush3.msra.mxu1 %v538_v41 }
 0x478   : > { %1383 = vmatprep.subr.mxu1 %v553_v42  ;;  %v1340_v42 = vld [vmem:[%s2048_s12] ss:$0 sm:$0xff] }
 0x479   : > { %1384 = vmatpush3.msra.mxu1 %v537_v43 }
 0x47a   : > { %1385 = vmatprep.subr.mxu1 %v552_v44 }
 0x47b   : > { %1386 = vmatpush3.msra.mxu1 %v536_v45 }
 0x47c   : > { %1387 = vmatprep.subr.mxu1 %v551_v46 }
 0x47d   : > { %1388 = vmatpush3.msra.mxu1 %v535_v47 }
 0x47e   : > { %1389 = vmatprep.subr.mxu1 %v550_v48 }
 0x47f   : > { %1390 = vmatpush3.msra.mxu1 %v534_v49 }
 0x480   : > { %1391 = vmatprep.subr.mxu1 %v549_v50 }
 0x481   : > { %1392 = vmatpush3.msra.mxu1 %v533_v51 }
 0x529   : > { %v1077_v59 = vpop.f32.mrf.mxu0 }
 0x52a   : > { %v1078_v60 = vadd.f32 %v1077_v59, %v1004_v57 }
 0x52b   : > { %v1079_v61 = vpop.f32.mrf.mxu0 }
 0x52c   : > { %v1092_v62 = vmul.f32 0.044715, %v1078_v60  ;;  %v1080_v63 = vadd.f32 %v1079_v61, %v1008_v58  ;;  %v1088_v0 = vmul.f32 0.5, %v1078_v60 }
 0x52d   : > { %v1083_v2 = vpop.f32.mrf.mxu0 }
 0x52e   : > { %v1096_v3 = vmul.f32 %v1092_v62, %v1078_v60  ;;  %v1093_v4 = vmul.f32 0.044715, %v1080_v63  ;;  %v1084_v5 = vadd.f32 %v1083_v2, %v1004_v57  ;;  %v1089_v30 = vmul.f32 0.5, %v1080_v63 }
 0x52f   : > { %v1085_v6 = vpop.f32.mrf.mxu0 }
 0x530   : > { %v1100_v7 = vmul.f32 %v1096_v3, %v1078_v60  ;;  %v1097_v8 = vmul.f32 %v1093_v4, %v1080_v63  ;;  %v1094_v9 = vmul.f32 0.044715, %v1084_v5  ;;  %v1086_v10 = vadd.f32 %v1085_v6, %v1008_v58 }
 0x531   : > { %v1090_v38 = vmul.f32 0.5, %v1084_v5 }
 0x532   : > { %v1104_v11 = vadd.f32 %v1100_v7, %v1078_v60  ;;  %v1098_v12 = vmul.f32 %v1094_v9, %v1084_v5  ;;  %v1095_v13 = vmul.f32 0.044715, %v1086_v10  ;;  %v1101_v14 = vmul.f32 %v1097_v8, %v1080_v63 }
 0x533   : > { %v1091_v36 = vmul.f32 0.5, %v1086_v10 }
 0x534   : > { %v1099_v15 = vmul.f32 %v1095_v13, %v1086_v10  ;;  %v1105_v16 = vadd.f32 %v1101_v14, %v1080_v63  ;;  %v1108_v17 = vmul.f32 0.7978846, %v1104_v11  ;;  %v1102_v18 = vmul.f32 %v1098_v12, %v1084_v5 }
 0x536   : > { %v1109_v19 = vmul.f32 0.7978846, %v1105_v16  ;;  %1517 = vtanh.f32 %v1108_v17  ;;  %v1103_v20 = vmul.f32 %v1099_v15, %v1086_v10  ;;  %v1106_v21 = vadd.f32 %v1102_v18, %v1084_v5 }
 0x538   : > { %1519 = vtanh.f32 %v1109_v19  ;;  %v1107_v23 = vadd.f32 %v1103_v20, %v1086_v10  ;;  %v1110_v24 = vmul.f32 0.7978846, %v1106_v21 }
 0x53a   : > { %v1111_v25 = vmul.f32 0.7978846, %v1107_v23  ;;  %1521 = vtanh.f32 %v1110_v24 }
 0x53c   : > { %1523 = vtanh.f32 %v1111_v25 }
 0x543   : > { %v1518_v27 = vpop.eup %1517 }
 0x544   : > { %v1116_v29 = vadd.f32 1.0, %v1518_v27 }
 0x545   : > { %v1520_v28 = vpop.eup %1519 }
 0x546   : > { %v1117_v32 = vadd.f32 1.0, %v1520_v28  ;;  %v1120_v1 = vmul.f32 %v1116_v29, %v1088_v0 }
 0x547   : > { %v1522_v31 = vpop.eup %1521 }
 0x548   : > { %v1121_v33 = vmul.f32 %v1117_v32, %v1089_v30  ;;  %v1118_v35 = vadd.f32 1.0, %v1522_v31 }
 0x549   : > { %v1524_v34 = vpop.eup %1523 }
 0x54a   : > { %1194 = vmatprep.mubr.f32.mxu1 %v1121_v33  ;;  %v1119_v37 = vadd.f32 1.0, %v1524_v34  ;;  %v1122_v40 = vmul.f32 %v1118_v35, %v1090_v38 }
 0x54b   : > { %1195 = vmatmul.mubr.f32.vlgmr.msra.gmra.mxu1 %v1120_v1 }
 0x54c   : > { %v1123_v39 = vmul.f32 %v1119_v37, %v1091_v36 }
 0x54e   : > { %1199 = vmatprep.mubr.f32.mxu1 %v1123_v39 }
 0x54f   : > { %1200 = vmatmul.mubr.f32.gmra.mxu1 %v1122_v40 }
 0x60b   : > { %v1393_v41 = vpop.f32.mrf.mxu1 }
 0x60d   : > { %v1394_v43 = vpop.f32.mrf.mxu1 }
 0x60e   : > { %v1395_v44 = vadd.f32 %v1394_v43, %v1393_v41 }
 0x60f   : > { %v1396_v45 = vpop.f32.mrf.mxu1 }
 0x610   : > { %v1197_v46 = vadd.f32 %v1395_v44, %v1340_v42 }
 0x611   : > { %v1397_v47 = vpop.f32.mrf.mxu1 }
 0x612   : > { %v1205_v48 = vadd.f32 %v1197_v46, %v1952_v22  ;;  %v1398_v49 = vadd.f32 %v1397_v47, %v1396_v45 }
 0x614   : > { %1207 = vst [vmem:[%s487_s23] sm:$0xff] %v1205_v48  ;;  %v1202_v50 = vadd.f32 %v1398_v49, %v1340_v42 }
 0x616   : > { %v1206_v51 = vadd.f32 %v1202_v50, %v1956_v26 }
 0x618   : > { %1341 = vst [vmem:[%s487_s23 + $0x8] sm:$0xff] %v1206_v51 }
 0x619   : > { %1618 = shalt.err (!%p1615_p9)
}
 0x61a   : > { %s1619_s15 = scalar_lea.hbm %s1993_s18, 256  ;;  %s1623_s21 = scalar_lea.hbm %s2049_s13, 1024 }
 0x61b   : > { %p1620_p12 = scmp.ne.s32.totalorder %s1993_s18, %s1619_s15  ;;  %p1624_p4 = scmp.lt.s32.totalorder %s1993_s18, %s2049_s13 }
 0x61c   : > { %p1625_p8 = scmp.lt.s32.totalorder %s1623_s21, %s1619_s15 }
 0x61d   : > { %p1621_p3 = pnand %p1620_p12, %p2083_p0 }
 0x61e   : > { %p1626_p7 = por %p1625_p8, %p1624_p4 }
 0x61f   : > { %p1622_p13 = pneg %p1621_p3 }
 0x621   : > { %p1627_p10 = pnand %p1626_p7, %p1622_p13 }
 0x623   : > { %1630 = shalt.err (!%p1627_p10)
}
 0x624   : > { %s1686_s14 = smov 128   ;;  %s1687_s16 = smov 8  }
 0x625   : > { %1433 = dma.vmem_to_hbm [thread:$0]  (%p2083_p0), %s1988_s11, 256, %s1993_s18, %s1211_s25, %s1686_s14, %s1686_s14, %s1687_s16  }
 0x626 PF: > { %s2084_s20 = sld [smem:[#allocation12_spill]]  ;;  %p1455_p1 = scmp.ge.s32.totalorder %s1673_s28, 2 }
 0x627   : > { %s2085_s29 = sld [smem:[#allocation14_spill]] }
 0x62c   : > { %s1239_s24 = sand.u32 1, %s2084_s20  }
 0x62d   : > { %p2086_p2 = scmp.ne.s32.totalorder %s2085_s29, 0  ;;  %s1240_s17 = scalar_lea.sflag [#allocation4], %s1239_s24 }
 0x62f   : > { %p1447_p6 = pnand %p1455_p1, %p2086_p2 }
 0x631   : > { %p1448_p11 = pneg %p1447_p6 }
 0x633   : > { %1656 = dma.done.wait (%p1448_p11), %s1240_s17, 256  }
 0x634   : > { %1658 = vsyncadd (%p1448_p11), %s1240_s17, 4294967040  ;;  %s2087_s28 = sld [smem:[#allocation15_spill]]  ;;  %s2090_s25 = smov %s1665_s26 }
 0x635   : > { %s2088_s15 = sld [smem:[#allocation13_spill]] }
 0x636   : > { %s2089_s27 = sld [smem:[#allocation16_spill]] }
 0x63a   : > { %p27_p5 = scmp.ge.s32.totalorder %s2087_s28, 6  }
 0x63b   : > { %s2091_s26 = smov %s2088_s15 }
 0x63c   :  { %29 = sbr.rel (!%p27_p5) target bundleno = 9 (0x9), region = 127 }
 0x641   :  { %1245 = vsyncpa [#allocation3], 1 }
 0x642   :  { %1247 = vsyncpa [#allocation3 + $0x1], 1 }
 0x643   :  { %1248 = vsyncpa [#allocation6], 1 }
 0x644   :  { %1249 = vsyncpa [#allocation4], 1 }
 0x645   :  { %1251 = vsyncpa [#allocation4 + $0x1], 1 }

</bundles_post_ra>
